<compile_context>
chip_gen: v7x
topology: tpu7x:2x2x1
jax: 0.10.0
libtpu: 0.0.40
codegen_flags: <defaults>
</compile_context>

<pallas_src>
import functools

import jax
import jax.numpy as jnp
from jax import lax
from jax.experimental import pallas as pl
from jax.experimental.pallas import tpu as pltpu


def _round_up(x, m):
    return (x + m - 1) // m * m


# -----------------------------------------------------------------------------
# Pass 1: 3x3 stride-2 conv (9 accumulated tap matmuls) + 1x1 stride-2 shortcut
#         conv (center-tap matmul) + per-image partial BN statistics.
#
#   x_ref  : (1, 4, HP2, WP2, CIN_PAD)  bf16  stride-2 phase planes, p = ph*2+pw
#   wm_ref : (KH*KW, CIN_PAD, COUT_PAD) bf16  main 3x3 weights, tap = kh*KW+kw
#   ws_ref : (CIN_PAD, COUT_PAD)        bf16  1x1 shortcut weights
#   ym_ref : (1, HW, COUT_PAD)          bf16  pre-BN main conv output
#   ys_ref : (1, HW, COUT_PAD)          bf16  pre-BN shortcut conv output
#   sum_ref: (1, 2, COUT_PAD)           f32   per-image channel sums
#   sq_ref : (1, 2, COUT_PAD)           f32   per-image channel sums of squares
# -----------------------------------------------------------------------------
def _conv_stats_kernel(x_ref, wm_ref, ws_ref, ym_ref, ys_ref, sum_ref, sq_ref,
                       *, k_h, k_w, h_out, w_out, cout_pad):
    hw = h_out * w_out
    acc_m = jnp.zeros((hw, cout_pad), jnp.float32)
    center2 = None
    for kh in range(k_h):
        ph, qh = kh % 2, kh // 2
        for kw in range(k_w):
            pw, qw = kw % 2, kw // 2
            # Tap (kh, kw) of the 3x3 window == phase plane (ph, pw) at a
            # contiguous (h_out, w_out) offset -> static, stride-free slice.
            tap = x_ref[0, ph * 2 + pw, qh:qh + h_out, qw:qw + w_out, :]
            tap2 = tap.reshape(hw, tap.shape[-1])
            if (kh, kw) == (k_h // 2, k_w // 2):
                center2 = tap2                      # reuse for the 1x1 shortcut
            acc_m = acc_m + jnp.dot(tap2, wm_ref[kh * k_w + kw],
                                    preferred_element_type=jnp.float32)

    # 1x1 stride-2 shortcut == the center tap of the 3x3 window (padding=K//2),
    # already resident in VMEM -> one extra Cin-deep matmul, no extra HBM read.
    acc_s = jnp.dot(center2, ws_ref[...], preferred_element_type=jnp.float32)

    ym_ref[0] = acc_m.astype(ym_ref.dtype)
    ys_ref[0] = acc_s.astype(ys_ref.dtype)

    # Per-image partial BN statistics (reduced over the batch in the wrapper,
    # so this grid axis stays "parallel" -> both TCs on v7x).
    sum_ref[0, 0:1, :] = jnp.sum(acc_m, axis=0, keepdims=True)
    sum_ref[0, 1:2, :] = jnp.sum(acc_s, axis=0, keepdims=True)
    sq_ref[0, 0:1, :] = jnp.sum(acc_m * acc_m, axis=0, keepdims=True)
    sq_ref[0, 1:2, :] = jnp.sum(acc_s * acc_s, axis=0, keepdims=True)


# -----------------------------------------------------------------------------
# Pass 2: pure VPU pass — folded BN scale/shift, ReLU, residual add, final ReLU
# -----------------------------------------------------------------------------
def _bn_relu_add_kernel(ym_ref, ys_ref, scale_ref, shift_ref, o_ref):
    ym = ym_ref[0].astype(jnp.float32)                     # (HW, COUT_PAD)
    ys = ys_ref[0].astype(jnp.float32)
    main = ym * scale_ref[0:1, :] + shift_ref[0:1, :]      # BN(conv3x3)
    sc = ys * scale_ref[1:2, :] + shift_ref[1:2, :]        # BN(conv1x1 shortcut)
    o_ref[0] = jnp.maximum(jnp.maximum(main, 0.0) + sc, 0.0).astype(o_ref.dtype)


# -----------------------------------------------------------------------------
# Wrapper: layout transform (glue) + two pallas_calls + BN stat folding
# -----------------------------------------------------------------------------
@functools.partial(jax.jit, static_argnames=("stride", "padding"))
def conv_block_forward(x_nchw, w_main, w_sc, g_main, b_main, g_sc, b_sc,
                       stride=2, padding=1):
    eps = 1e-5
    N, Cin, H, W = x_nchw.shape
    Cout, _, KH, KW = w_main.shape
    assert stride == 2, "phase-split conv path is specialised for stride 2"
    assert KH % 2 == 1 and KW % 2 == 1
    assert padding == KH // 2 == KW // 2, \
        "center-tap shortcut fusion needs 'same'-style padding"

    H_out = (H + 2 * padding - KH) // stride + 1
    W_out = (W + 2 * padding - KW) // stride + 1
    HW = H_out * W_out
    M = N * HW

    CIN_PAD = _round_up(Cin, 128)     # lane-dense input loads
    COUT_PAD = _round_up(Cout, 128)   # lane-dense output stores

    # ---- pad + stride-2 space-to-depth (one-shot XLA layout transform) ------
    Hp, Wp = H + 2 * padding, W + 2 * padding
    Hp_e, Wp_e = _round_up(Hp, 2), _round_up(Wp, 2)
    Hp2, Wp2 = Hp_e // 2, Wp_e // 2
    assert Hp2 >= H_out + (KH - 1) // 2 and Wp2 >= W_out + (KW - 1) // 2

    x = jnp.transpose(x_nchw, (0, 2, 3, 1))                         # NHWC
    x_pad = jnp.pad(x, ((0, 0),
                        (padding, Hp_e - Hp + padding),
                        (padding, Wp_e - Wp + padding),
                        (0, CIN_PAD - Cin)))
    x_s2d = x_pad.reshape(N, Hp2, 2, Wp2, 2, CIN_PAD)
    x_s2d = jnp.transpose(x_s2d, (0, 2, 4, 1, 3, 5))                # (N,ph,pw,...)
    x_s2d = x_s2d.reshape(N, 4, Hp2, Wp2, CIN_PAD).astype(jnp.bfloat16)

    # ---- weights: (tap, Cin, Cout) main conv, (Cin, Cout) shortcut ----------
    wm = jnp.zeros((KH * KW, CIN_PAD, COUT_PAD), jnp.float32)
    wm = wm.at[:, :Cin, :Cout].set(
        jnp.transpose(w_main, (2, 3, 1, 0)).reshape(KH * KW, Cin, Cout))
    wm = wm.astype(jnp.bfloat16)
    ws = jnp.zeros((CIN_PAD, COUT_PAD), jnp.float32)
    ws = ws.at[:Cin, :Cout].set(w_sc.reshape(Cout, Cin).T).astype(jnp.bfloat16)

    # ---- VMEM budget: actual buffer bytes (+25% headroom), no hard-coded cap -
    x_blk = 4 * Hp2 * Wp2 * CIN_PAD * 2
    w_blk = (KH * KW + 1) * CIN_PAD * COUT_PAD * 2
    y_blk = HW * COUT_PAD * 2
    st_blk = 2 * COUT_PAD * 4
    f32_tmp = 4 * HW * COUT_PAD * 4
    p1_bytes = 2 * x_blk + 2 * w_blk + 2 * 2 * y_blk + 2 * 2 * st_blk + f32_tmp
    p2_bytes = 2 * 2 * y_blk + 2 * HW * COUT_PAD * 4 + 4 * st_blk + f32_tmp

    def _vmem_limit(b):
        # floor 4 MiB, cap well under v7x's 64 MiB per-TC VMEM
        return int(min(40 * 1024 * 1024, max(4 * 1024 * 1024, int(b * 1.25))))

    # ---- block specs ---------------------------------------------------------
    # NOTE: the constant-index specs (weights, scale/shift) could additionally
    # use pipeline_mode=pl.Buffered(1) to reclaim their second buffer.
    x_spec = pl.BlockSpec((1, 4, Hp2, Wp2, CIN_PAD), lambda n: (n, 0, 0, 0, 0))
    wm_spec = pl.BlockSpec((KH * KW, CIN_PAD, COUT_PAD), lambda n: (0, 0, 0))
    ws_spec = pl.BlockSpec((CIN_PAD, COUT_PAD), lambda n: (0, 0))
    y_spec = pl.BlockSpec((1, HW, COUT_PAD), lambda n: (n, 0, 0))
    st_spec = pl.BlockSpec((1, 2, COUT_PAD), lambda n: (n, 0, 0))
    vec_spec = pl.BlockSpec((2, COUT_PAD), lambda n: (0, 0))

    # ---- pass 1: conv (main + shortcut) + partial BN statistics --------------
    ym, ys, psum, psq = pl.pallas_call(
        functools.partial(_conv_stats_kernel, k_h=KH, k_w=KW,
                          h_out=H_out, w_out=W_out, cout_pad=COUT_PAD),
        out_shape=(jax.ShapeDtypeStruct((N, HW, COUT_PAD), jnp.bfloat16),
                   jax.ShapeDtypeStruct((N, HW, COUT_PAD), jnp.bfloat16),
                   jax.ShapeDtypeStruct((N, 2, COUT_PAD), jnp.float32),
                   jax.ShapeDtypeStruct((N, 2, COUT_PAD), jnp.float32)),
        grid=(N,),
        in_specs=[x_spec, wm_spec, ws_spec],
        out_specs=(y_spec, y_spec, st_spec, st_spec),
        compiler_params=pltpu.CompilerParams(
            dimension_semantics=("parallel",),
            vmem_limit_bytes=_vmem_limit(p1_bytes)),
    )(x_s2d, wm, ws)

    # ---- fold BN into per-channel scale/shift in the wrapper (tiny XLA ops) --
    m_total = jnp.float32(M)
    mean = jnp.sum(psum, axis=0) / m_total                       # (2, COUT_PAD)
    # TODO(synk): E[x^2]-E[x]^2 in f32 can cancel for |mean|>>std at very large
    #             M; switch to mean-shifted / Welford accumulation if needed.
    var = jnp.maximum(jnp.sum(psq, axis=0) / m_total - mean * mean, 0.0)
    gamma = jnp.zeros((2, COUT_PAD), jnp.float32)
    gamma = gamma.at[0, :Cout].set(g_main).at[1, :Cout].set(g_sc)
    beta = jnp.zeros((2, COUT_PAD), jnp.float32)
    beta = beta.at[0, :Cout].set(b_main).at[1, :Cout].set(b_sc)
    scale = gamma * lax.rsqrt(var + eps)
    shift = beta - mean * scale

    # ---- pass 2: BN scale/shift + ReLU + residual add + ReLU -----------------
    out_padded = pl.pallas_call(
        _bn_relu_add_kernel,
        out_shape=jax.ShapeDtypeStruct((N, HW, COUT_PAD), x_nchw.dtype),
        grid=(N,),
        in_specs=[y_spec, y_spec, vec_spec, vec_spec],
        out_specs=pl.BlockSpec((1, HW, COUT_PAD), lambda n: (n, 0, 0)),
        compiler_params=pltpu.CompilerParams(
            dimension_semantics=("parallel",),
            vmem_limit_bytes=_vmem_limit(p2_bytes)),
    )(ym, ys, scale, shift)

    # (N, HW, COUT_PAD) -> (N, Ho, Wo, Cout) -> NCHW (PyTorch module interface;
    # pure glue — keep NHWC end-to-end inside a real NHWC pipeline).
    out = out_padded[:, :, :Cout].reshape(N, H_out, W_out, Cout)
    return jnp.transpose(out, (0, 3, 1, 2))


# -----------------------------------------------------------------------------
# Pure-JAX reference (same semantics, f32) for correctness check
# -----------------------------------------------------------------------------
def reference_forward(x, w_main, w_sc, g_main, b_main, g_sc, b_sc,
                      stride=2, padding=1):
    eps = 1e-5

    def bn(y, g, b):
        mean = jnp.mean(y, axis=(0, 2, 3), keepdims=True)
        var = jnp.mean((y - mean) ** 2, axis=(0, 2, 3), keepdims=True)
        return (y - mean) * lax.rsqrt(var + eps) * g.reshape(1, -1, 1, 1) \
               + b.reshape(1, -1, 1, 1)

    out = lax.conv_general_dilated(x, w_main, (stride, stride),
                                   [(padding, padding), (padding, padding)],
                                   dimension_numbers=("NCHW", "OIHW", "NCHW"))
    out = jnp.maximum(bn(out, g_main, b_main), 0.0)
    identity = lax.conv_general_dilated(x, w_sc, (stride, stride),
                                        [(0, 0), (0, 0)],
                                        dimension_numbers=("NCHW", "OIHW", "NCHW"))
    identity = bn(identity, g_sc, b_sc)
    return jnp.maximum(out + identity, 0.0)


if __name__ == "__main__":
    N, Cin, H, W = 2, 4, 16, 16
    Cout, K, stride, padding = 8, 3, 2, 1

    key = jax.random.PRNGKey(0)
    k1, k2, k3, k4, k5 = jax.random.split(key, 5)
    x = jax.random.normal(k1, (N, Cin, H, W), jnp.float32)
    w_main = jax.random.normal(k2, (Cout, Cin, K, K), jnp.float32) * 0.1
    w_sc = jax.random.normal(k3, (Cout, Cin, 1, 1), jnp.float32) * 0.1
    g_main = 1.0 + 0.1 * jax.random.normal(k4, (Cout,), jnp.float32)
    b_main = 0.1 * jax.random.normal(k5, (Cout,), jnp.float32)
    g_sc = jnp.ones((Cout,), jnp.float32)
    b_sc = jnp.zeros((Cout,), jnp.float32)

    out = conv_block_forward(x, w_main, w_sc, g_main, b_main, g_sc, b_sc,
                             stride=stride, padding=padding)
    out = jax.block_until_ready(out)

    ref = reference_forward(x, w_main, w_sc, g_main, b_main, g_sc, b_sc,
                            stride=stride, padding=padding)
    assert out.shape == (N, Cout, H // stride, W // stride)
    max_err = float(jnp.max(jnp.abs(out - ref)))
    assert jnp.allclose(out, ref, atol=5e-2, rtol=5e-2), \
        f"mismatch vs reference (max abs err = {max_err})"

    print("KERNEL_OK")
</pallas_src>

<mosaic_0001>
module attributes {stable_mosaic.version = 11 : i64} {
  func.func @_conv_stats_kernel(%arg0: i32, %arg1: memref<1x4x9x9x128xbf16, #tpu.memory_space<vmem>>, %arg2: memref<9x128x128xbf16, #tpu.memory_space<vmem>>, %arg3: memref<128x128xbf16, #tpu.memory_space<vmem>>, %arg4: memref<1x64x128xbf16, #tpu.memory_space<vmem>>, %arg5: memref<1x64x128xbf16, #tpu.memory_space<vmem>>, %arg6: memref<1x2x128xf32, #tpu.memory_space<vmem>>, %arg7: memref<1x2x128xf32, #tpu.memory_space<vmem>>) attributes {dimension_semantics = [#tpu.dimension_semantics<parallel>], iteration_bounds = array<i64: 2>, scalar_prefetch = 0 : i64, scratch_operands = 0 : i64, tpu.core_type = #tpu.core_type<tc>, window_params = [{transform_indices = @transform_0, window_bounds = array<i64: 1, 4, 9, 9, 128>}, {pipeline_mode = #tpu.pipeline_mode<synchronous>, transform_indices = @transform_1, window_bounds = array<i64: 9, 128, 128>}, {pipeline_mode = #tpu.pipeline_mode<synchronous>, transform_indices = @transform_2, window_bounds = array<i64: 128, 128>}, {transform_indices = @transform_3, window_bounds = array<i64: 1, 64, 128>}, {transform_indices = @transform_4, window_bounds = array<i64: 1, 64, 128>}, {transform_indices = @transform_5, window_bounds = array<i64: 1, 2, 128>}, {transform_indices = @transform_6, window_bounds = array<i64: 1, 2, 128>}]} {
    %cst = arith.constant 0.000000e+00 : f32
    %0 = vector.broadcast %cst : f32 to vector<64x128xf32>
    %c0 = arith.constant 0 : index
    %c0_0 = arith.constant 0 : index
    %c0_1 = arith.constant 0 : index
    %c0_2 = arith.constant 0 : index
    %c0_3 = arith.constant 0 : index
    %1 = vector.load %arg1[%c0, %c0_0, %c0_1, %c0_2, %c0_3] : memref<1x4x9x9x128xbf16, #tpu.memory_space<vmem>>, vector<1x1x8x8x128xbf16>
    %2 = vector.shape_cast %1 : vector<1x1x8x8x128xbf16> to vector<8x8x128xbf16>
    %3 = vector.shape_cast %2 : vector<8x8x128xbf16> to vector<64x128xbf16>
    %c0_4 = arith.constant 0 : index
    %c0_5 = arith.constant 0 : index
    %c0_6 = arith.constant 0 : index
    %4 = vector.load %arg2[%c0_4, %c0_5, %c0_6] : memref<9x128x128xbf16, #tpu.memory_space<vmem>>, vector<1x128x128xbf16>
    %5 = vector.shape_cast %4 : vector<1x128x128xbf16> to vector<128x128xbf16>
    %cst_7 = arith.constant dense<0.000000e+00> : vector<64x128xf32>
    %6 = tpu.matmul %3, %5, %cst_7 {dimension_numbers = #tpu.dot_dimension_numbers<[1], [0], [0], [1], [0, 0, 1, 1], [], []>} : vector<64x128xbf16>, vector<128x128xbf16>, vector<64x128xf32> -> vector<64x128xf32>
    %7 = arith.addf %0, %6 : vector<64x128xf32>
    %c0_8 = arith.constant 0 : index
    %c1 = arith.constant 1 : index
    %c0_9 = arith.constant 0 : index
    %c0_10 = arith.constant 0 : index
    %c0_11 = arith.constant 0 : index
    %8 = vector.load %arg1[%c0_8, %c1, %c0_9, %c0_10, %c0_11] : memref<1x4x9x9x128xbf16, #tpu.memory_space<vmem>>, vector<1x1x8x8x128xbf16>
    %9 = vector.shape_cast %8 : vector<1x1x8x8x128xbf16> to vector<8x8x128xbf16>
    %10 = vector.shape_cast %9 : vector<8x8x128xbf16> to vector<64x128xbf16>
    %c1_12 = arith.constant 1 : index
    %c0_13 = arith.constant 0 : index
    %c0_14 = arith.constant 0 : index
    %11 = vector.load %arg2[%c1_12, %c0_13, %c0_14] : memref<9x128x128xbf16, #tpu.memory_space<vmem>>, vector<1x128x128xbf16>
    %12 = vector.shape_cast %11 : vector<1x128x128xbf16> to vector<128x128xbf16>
    %cst_15 = arith.constant dense<0.000000e+00> : vector<64x128xf32>
    %13 = tpu.matmul %10, %12, %cst_15 {dimension_numbers = #tpu.dot_dimension_numbers<[1], [0], [0], [1], [0, 0, 1, 1], [], []>} : vector<64x128xbf16>, vector<128x128xbf16>, vector<64x128xf32> -> vector<64x128xf32>
    %14 = arith.addf %7, %13 : vector<64x128xf32>
    %c0_16 = arith.constant 0 : index
    %c0_17 = arith.constant 0 : index
    %c0_18 = arith.constant 0 : index
    %c1_19 = arith.constant 1 : index
    %c0_20 = arith.constant 0 : index
    %15 = vector.load %arg1[%c0_16, %c0_17, %c0_18, %c1_19, %c0_20] : memref<1x4x9x9x128xbf16, #tpu.memory_space<vmem>>, vector<1x1x8x8x128xbf16>
    %16 = vector.shape_cast %15 : vector<1x1x8x8x128xbf16> to vector<8x8x128xbf16>
    %17 = vector.shape_cast %16 : vector<8x8x128xbf16> to vector<64x128xbf16>
    %c2 = arith.constant 2 : index
    %c0_21 = arith.constant 0 : index
    %c0_22 = arith.constant 0 : index
    %18 = vector.load %arg2[%c2, %c0_21, %c0_22] : memref<9x128x128xbf16, #tpu.memory_space<vmem>>, vector<1x128x128xbf16>
    %19 = vector.shape_cast %18 : vector<1x128x128xbf16> to vector<128x128xbf16>
    %cst_23 = arith.constant dense<0.000000e+00> : vector<64x128xf32>
    %20 = tpu.matmul %17, %19, %cst_23 {dimension_numbers = #tpu.dot_dimension_numbers<[1], [0], [0], [1], [0, 0, 1, 1], [], []>} : vector<64x128xbf16>, vector<128x128xbf16>, vector<64x128xf32> -> vector<64x128xf32>
    %21 = arith.addf %14, %20 : vector<64x128xf32>
    %c0_24 = arith.constant 0 : index
    %c2_25 = arith.constant 2 : index
    %c0_26 = arith.constant 0 : index
    %c0_27 = arith.constant 0 : index
    %c0_28 = arith.constant 0 : index
    %22 = vector.load %arg1[%c0_24, %c2_25, %c0_26, %c0_27, %c0_28] : memref<1x4x9x9x128xbf16, #tpu.memory_space<vmem>>, vector<1x1x8x8x128xbf16>
    %23 = vector.shape_cast %22 : vector<1x1x8x8x128xbf16> to vector<8x8x128xbf16>
    %24 = vector.shape_cast %23 : vector<8x8x128xbf16> to vector<64x128xbf16>
    %c3 = arith.constant 3 : index
    %c0_29 = arith.constant 0 : index
    %c0_30 = arith.constant 0 : index
    %25 = vector.load %arg2[%c3, %c0_29, %c0_30] : memref<9x128x128xbf16, #tpu.memory_space<vmem>>, vector<1x128x128xbf16>
    %26 = vector.shape_cast %25 : vector<1x128x128xbf16> to vector<128x128xbf16>
    %cst_31 = arith.constant dense<0.000000e+00> : vector<64x128xf32>
    %27 = tpu.matmul %24, %26, %cst_31 {dimension_numbers = #tpu.dot_dimension_numbers<[1], [0], [0], [1], [0, 0, 1, 1], [], []>} : vector<64x128xbf16>, vector<128x128xbf16>, vector<64x128xf32> -> vector<64x128xf32>
    %28 = arith.addf %21, %27 : vector<64x128xf32>
    %c0_32 = arith.constant 0 : index
    %c3_33 = arith.constant 3 : index
    %c0_34 = arith.constant 0 : index
    %c0_35 = arith.constant 0 : index
    %c0_36 = arith.constant 0 : index
    %29 = vector.load %arg1[%c0_32, %c3_33, %c0_34, %c0_35, %c0_36] : memref<1x4x9x9x128xbf16, #tpu.memory_space<vmem>>, vector<1x1x8x8x128xbf16>
    %30 = vector.shape_cast %29 : vector<1x1x8x8x128xbf16> to vector<8x8x128xbf16>
    %31 = vector.shape_cast %30 : vector<8x8x128xbf16> to vector<64x128xbf16>
    %c4 = arith.constant 4 : index
    %c0_37 = arith.constant 0 : index
    %c0_38 = arith.constant 0 : index
    %32 = vector.load %arg2[%c4, %c0_37, %c0_38] : memref<9x128x128xbf16, #tpu.memory_space<vmem>>, vector<1x128x128xbf16>
    %33 = vector.shape_cast %32 : vector<1x128x128xbf16> to vector<128x128xbf16>
    %cst_39 = arith.constant dense<0.000000e+00> : vector<64x128xf32>
    %34 = tpu.matmul %31, %33, %cst_39 {dimension_numbers = #tpu.dot_dimension_numbers<[1], [0], [0], [1], [0, 0, 1, 1], [], []>} : vector<64x128xbf16>, vector<128x128xbf16>, vector<64x128xf32> -> vector<64x128xf32>
    %35 = arith.addf %28, %34 : vector<64x128xf32>
    %c0_40 = arith.constant 0 : index
    %c2_41 = arith.constant 2 : index
    %c0_42 = arith.constant 0 : index
    %c1_43 = arith.constant 1 : index
    %c0_44 = arith.constant 0 : index
    %36 = vector.load %arg1[%c0_40, %c2_41, %c0_42, %c1_43, %c0_44] : memref<1x4x9x9x128xbf16, #tpu.memory_space<vmem>>, vector<1x1x8x8x128xbf16>
    %37 = vector.shape_cast %36 : vector<1x1x8x8x128xbf16> to vector<8x8x128xbf16>
    %38 = vector.shape_cast %37 : vector<8x8x128xbf16> to vector<64x128xbf16>
    %c5 = arith.constant 5 : index
    %c0_45 = arith.constant 0 : index
    %c0_46 = arith.constant 0 : index
    %39 = vector.load %arg2[%c5, %c0_45, %c0_46] : memref<9x128x128xbf16, #tpu.memory_space<vmem>>, vector<1x128x128xbf16>
    %40 = vector.shape_cast %39 : vector<1x128x128xbf16> to vector<128x128xbf16>
    %cst_47 = arith.constant dense<0.000000e+00> : vector<64x128xf32>
    %41 = tpu.matmul %38, %40, %cst_47 {dimension_numbers = #tpu.dot_dimension_numbers<[1], [0], [0], [1], [0, 0, 1, 1], [], []>} : vector<64x128xbf16>, vector<128x128xbf16>, vector<64x128xf32> -> vector<64x128xf32>
    %42 = arith.addf %35, %41 : vector<64x128xf32>
    %c0_48 = arith.constant 0 : index
    %c0_49 = arith.constant 0 : index
    %c1_50 = arith.constant 1 : index
    %c0_51 = arith.constant 0 : index
    %c0_52 = arith.constant 0 : index
    %43 = vector.load %arg1[%c0_48, %c0_49, %c1_50, %c0_51, %c0_52] : memref<1x4x9x9x128xbf16, #tpu.memory_space<vmem>>, vector<1x1x8x8x128xbf16>
    %44 = vector.shape_cast %43 : vector<1x1x8x8x128xbf16> to vector<8x8x128xbf16>
    %45 = vector.shape_cast %44 : vector<8x8x128xbf16> to vector<64x128xbf16>
    %c6 = arith.constant 6 : index
    %c0_53 = arith.constant 0 : index
    %c0_54 = arith.constant 0 : index
    %46 = vector.load %arg2[%c6, %c0_53, %c0_54] : memref<9x128x128xbf16, #tpu.memory_space<vmem>>, vector<1x128x128xbf16>
    %47 = vector.shape_cast %46 : vector<1x128x128xbf16> to vector<128x128xbf16>
    %cst_55 = arith.constant dense<0.000000e+00> : vector<64x128xf32>
    %48 = tpu.matmul %45, %47, %cst_55 {dimension_numbers = #tpu.dot_dimension_numbers<[1], [0], [0], [1], [0, 0, 1, 1], [], []>} : vector<64x128xbf16>, vector<128x128xbf16>, vector<64x128xf32> -> vector<64x128xf32>
    %49 = arith.addf %42, %48 : vector<64x128xf32>
    %c0_56 = arith.constant 0 : index
    %c1_57 = arith.constant 1 : index
    %c1_58 = arith.constant 1 : index
    %c0_59 = arith.constant 0 : index
    %c0_60 = arith.constant 0 : index
    %50 = vector.load %arg1[%c0_56, %c1_57, %c1_58, %c0_59, %c0_60] : memref<1x4x9x9x128xbf16, #tpu.memory_space<vmem>>, vector<1x1x8x8x128xbf16>
    %51 = vector.shape_cast %50 : vector<1x1x8x8x128xbf16> to vector<8x8x128xbf16>
    %52 = vector.shape_cast %51 : vector<8x8x128xbf16> to vector<64x128xbf16>
    %c7 = arith.constant 7 : index
    %c0_61 = arith.constant 0 : index
    %c0_62 = arith.constant 0 : index
    %53 = vector.load %arg2[%c7, %c0_61, %c0_62] : memref<9x128x128xbf16, #tpu.memory_space<vmem>>, vector<1x128x128xbf16>
    %54 = vector.shape_cast %53 : vector<1x128x128xbf16> to vector<128x128xbf16>
    %cst_63 = arith.constant dense<0.000000e+00> : vector<64x128xf32>
    %55 = tpu.matmul %52, %54, %cst_63 {dimension_numbers = #tpu.dot_dimension_numbers<[1], [0], [0], [1], [0, 0, 1, 1], [], []>} : vector<64x128xbf16>, vector<128x128xbf16>, vector<64x128xf32> -> vector<64x128xf32>
    %56 = arith.addf %49, %55 : vector<64x128xf32>
    %c0_64 = arith.constant 0 : index
    %c0_65 = arith.constant 0 : index
    %c1_66 = arith.constant 1 : index
    %c1_67 = arith.constant 1 : index
    %c0_68 = arith.constant 0 : index
    %57 = vector.load %arg1[%c0_64, %c0_65, %c1_66, %c1_67, %c0_68] : memref<1x4x9x9x128xbf16, #tpu.memory_space<vmem>>, vector<1x1x8x8x128xbf16>
    %58 = vector.shape_cast %57 : vector<1x1x8x8x128xbf16> to vector<8x8x128xbf16>
    %59 = vector.shape_cast %58 : vector<8x8x128xbf16> to vector<64x128xbf16>
    %c8 = arith.constant 8 : index
    %c0_69 = arith.constant 0 : index
    %c0_70 = arith.constant 0 : index
    %60 = vector.load %arg2[%c8, %c0_69, %c0_70] : memref<9x128x128xbf16, #tpu.memory_space<vmem>>, vector<1x128x128xbf16>
    %61 = vector.shape_cast %60 : vector<1x128x128xbf16> to vector<128x128xbf16>
    %cst_71 = arith.constant dense<0.000000e+00> : vector<64x128xf32>
    %62 = tpu.matmul %59, %61, %cst_71 {dimension_numbers = #tpu.dot_dimension_numbers<[1], [0], [0], [1], [0, 0, 1, 1], [], []>} : vector<64x128xbf16>, vector<128x128xbf16>, vector<64x128xf32> -> vector<64x128xf32>
    %63 = arith.addf %56, %62 : vector<64x128xf32>
    %c0_72 = arith.constant 0 : index
    %c0_73 = arith.constant 0 : index
    %64 = vector.load %arg3[%c0_72, %c0_73] : memref<128x128xbf16, #tpu.memory_space<vmem>>, vector<128x128xbf16>
    %cst_74 = arith.constant dense<0.000000e+00> : vector<64x128xf32>
    %65 = tpu.matmul %31, %64, %cst_74 {dimension_numbers = #tpu.dot_dimension_numbers<[1], [0], [0], [1], [0, 0, 1, 1], [], []>} : vector<64x128xbf16>, vector<128x128xbf16>, vector<64x128xf32> -> vector<64x128xf32>
    %66 = arith.truncf %63 : vector<64x128xf32> to vector<64x128xbf16>
    %c0_75 = arith.constant 0 : index
    %c0_76 = arith.constant 0 : index
    %c0_77 = arith.constant 0 : index
    %67 = vector.load %arg4[%c0_75, %c0_76, %c0_77] : memref<1x64x128xbf16, #tpu.memory_space<vmem>>, vector<1x64x128xbf16>
    %68 = vector.shape_cast %67 : vector<1x64x128xbf16> to vector<64x128xbf16>
    %69 = vector.shape_cast %66 : vector<64x128xbf16> to vector<1x64x128xbf16>
    tpu.vector_store %arg4[%c0_75, %c0_76, %c0_77], %69 {strides = array<i32>} : memref<1x64x128xbf16, #tpu.memory_space<vmem>>, vector<1x64x128xbf16>,
    %70 = arith.truncf %65 : vector<64x128xf32> to vector<64x128xbf16>
    %c0_78 = arith.constant 0 : index
    %c0_79 = arith.constant 0 : index
    %c0_80 = arith.constant 0 : index
    %71 = vector.load %arg5[%c0_78, %c0_79, %c0_80] : memref<1x64x128xbf16, #tpu.memory_space<vmem>>, vector<1x64x128xbf16>
    %72 = vector.shape_cast %71 : vector<1x64x128xbf16> to vector<64x128xbf16>
    %73 = vector.shape_cast %70 : vector<64x128xbf16> to vector<1x64x128xbf16>
    tpu.vector_store %arg5[%c0_78, %c0_79, %c0_80], %73 {strides = array<i32>} : memref<1x64x128xbf16, #tpu.memory_space<vmem>>, vector<1x64x128xbf16>,
    %cst_81 = arith.constant dense<0.000000e+00> : vector<128xf32>
    %74 = vector.multi_reduction <add>, %63, %cst_81 [0] : vector<64x128xf32> to vector<128xf32>
    %75 = vector.shape_cast %74 : vector<128xf32> to vector<1x128xf32>
    %c0_82 = arith.constant 0 : index
    %c0_83 = arith.constant 0 : index
    %c0_84 = arith.constant 0 : index
    %76 = vector.load %arg6[%c0_82, %c0_83, %c0_84] : memref<1x2x128xf32, #tpu.memory_space<vmem>>, vector<1x1x128xf32>
    %77 = vector.shape_cast %76 : vector<1x1x128xf32> to vector<1x128xf32>
    %78 = vector.shape_cast %75 : vector<1x128xf32> to vector<1x1x128xf32>
    tpu.vector_store %arg6[%c0_82, %c0_83, %c0_84], %78 {strides = array<i32>} : memref<1x2x128xf32, #tpu.memory_space<vmem>>, vector<1x1x128xf32>,
    %cst_85 = arith.constant dense<0.000000e+00> : vector<128xf32>
    %79 = vector.multi_reduction <add>, %65, %cst_85 [0] : vector<64x128xf32> to vector<128xf32>
    %80 = vector.shape_cast %79 : vector<128xf32> to vector<1x128xf32>
    %c0_86 = arith.constant 0 : index
    %c1_87 = arith.constant 1 : index
    %c0_88 = arith.constant 0 : index
    %81 = vector.load %arg6[%c0_86, %c1_87, %c0_88] : memref<1x2x128xf32, #tpu.memory_space<vmem>>, vector<1x1x128xf32>
    %82 = vector.shape_cast %81 : vector<1x1x128xf32> to vector<1x128xf32>
    %83 = vector.shape_cast %80 : vector<1x128xf32> to vector<1x1x128xf32>
    tpu.vector_store %arg6[%c0_86, %c1_87, %c0_88], %83 {strides = array<i32>} : memref<1x2x128xf32, #tpu.memory_space<vmem>>, vector<1x1x128xf32>,
    %84 = arith.mulf %63, %63 : vector<64x128xf32>
    %cst_89 = arith.constant dense<0.000000e+00> : vector<128xf32>
    %85 = vector.multi_reduction <add>, %84, %cst_89 [0] : vector<64x128xf32> to vector<128xf32>
    %86 = vector.shape_cast %85 : vector<128xf32> to vector<1x128xf32>
    %c0_90 = arith.constant 0 : index
    %c0_91 = arith.constant 0 : index
    %c0_92 = arith.constant 0 : index
    %87 = vector.load %arg7[%c0_90, %c0_91, %c0_92] : memref<1x2x128xf32, #tpu.memory_space<vmem>>, vector<1x1x128xf32>
    %88 = vector.shape_cast %87 : vector<1x1x128xf32> to vector<1x128xf32>
    %89 = vector.shape_cast %86 : vector<1x128xf32> to vector<1x1x128xf32>
    tpu.vector_store %arg7[%c0_90, %c0_91, %c0_92], %89 {strides = array<i32>} : memref<1x2x128xf32, #tpu.memory_space<vmem>>, vector<1x1x128xf32>,
    %90 = arith.mulf %65, %65 : vector<64x128xf32>
    %cst_93 = arith.constant dense<0.000000e+00> : vector<128xf32>
    %91 = vector.multi_reduction <add>, %90, %cst_93 [0] : vector<64x128xf32> to vector<128xf32>
    %92 = vector.shape_cast %91 : vector<128xf32> to vector<1x128xf32>
    %c0_94 = arith.constant 0 : index
    %c1_95 = arith.constant 1 : index
    %c0_96 = arith.constant 0 : index
    %93 = vector.load %arg7[%c0_94, %c1_95, %c0_96] : memref<1x2x128xf32, #tpu.memory_space<vmem>>, vector<1x1x128xf32>
    %94 = vector.shape_cast %93 : vector<1x1x128xf32> to vector<1x128xf32>
    %95 = vector.shape_cast %92 : vector<1x128xf32> to vector<1x1x128xf32>
    tpu.vector_store %arg7[%c0_94, %c1_95, %c0_96], %95 {strides = array<i32>} : memref<1x2x128xf32, #tpu.memory_space<vmem>>, vector<1x1x128xf32>,
    return
  }
  func.func @transform_0(%arg0: i32) -> (i32, i32, i32, i32, i32) {
    %c0_i32 = arith.constant 0 : i32
    %c0_i32_0 = arith.constant 0 : i32
    %c0_i32_1 = arith.constant 0 : i32
    %c0_i32_2 = arith.constant 0 : i32
    %c0_i32_3 = arith.constant 0 : i32
    return %arg0, %c0_i32, %c0_i32_0, %c0_i32_1, %c0_i32_2 : i32, i32, i32, i32, i32
  }
  func.func @transform_1(%arg0: i32) -> (i32, i32, i32) {
    %c0_i32 = arith.constant 0 : i32
    %c0_i32_0 = arith.constant 0 : i32
    %c0_i32_1 = arith.constant 0 : i32
    %c0_i32_2 = arith.constant 0 : i32
    return %c0_i32, %c0_i32_0, %c0_i32_1 : i32, i32, i32
  }
  func.func @transform_2(%arg0: i32) -> (i32, i32) {
    %c0_i32 = arith.constant 0 : i32
    %c0_i32_0 = arith.constant 0 : i32
    %c0_i32_1 = arith.constant 0 : i32
    return %c0_i32, %c0_i32_0 : i32, i32
  }
  func.func @transform_3(%arg0: i32) -> (i32, i32, i32) {
    %c0_i32 = arith.constant 0 : i32
    %c0_i32_0 = arith.constant 0 : i32
    %c0_i32_1 = arith.constant 0 : i32
    return %arg0, %c0_i32, %c0_i32_0 : i32, i32, i32
  }
  func.func @transform_4(%arg0: i32) -> (i32, i32, i32) {
    %c0_i32 = arith.constant 0 : i32
    %c0_i32_0 = arith.constant 0 : i32
    %c0_i32_1 = arith.constant 0 : i32
    return %arg0, %c0_i32, %c0_i32_0 : i32, i32, i32
  }
  func.func @transform_5(%arg0: i32) -> (i32, i32, i32) {
    %c0_i32 = arith.constant 0 : i32
    %c0_i32_0 = arith.constant 0 : i32
    %c0_i32_1 = arith.constant 0 : i32
    return %arg0, %c0_i32, %c0_i32_0 : i32, i32, i32
  }
  func.func @transform_6(%arg0: i32) -> (i32, i32, i32) {
    %c0_i32 = arith.constant 0 : i32
    %c0_i32_0 = arith.constant 0 : i32
    %c0_i32_1 = arith.constant 0 : i32
    return %arg0, %c0_i32, %c0_i32_0 : i32, i32, i32
  }
}

module attributes {stable_mosaic.version = 11 : i64} {
  func.func @_bn_relu_add_kernel(%arg0: i32, %arg1: memref<1x64x128xbf16, #tpu.memory_space<vmem>>, %arg2: memref<1x64x128xbf16, #tpu.memory_space<vmem>>, %arg3: memref<2x128xf32, #tpu.memory_space<vmem>>, %arg4: memref<2x128xf32, #tpu.memory_space<vmem>>, %arg5: memref<1x64x128xf32, #tpu.memory_space<vmem>>) attributes {dimension_semantics = [#tpu.dimension_semantics<parallel>], iteration_bounds = array<i64: 2>, scalar_prefetch = 0 : i64, scratch_operands = 0 : i64, tpu.core_type = #tpu.core_type<tc>, window_params = [{transform_indices = @transform_0, window_bounds = array<i64: 1, 64, 128>}, {transform_indices = @transform_1, window_bounds = array<i64: 1, 64, 128>}, {pipeline_mode = #tpu.pipeline_mode<synchronous>, transform_indices = @transform_2, window_bounds = array<i64: 2, 128>}, {pipeline_mode = #tpu.pipeline_mode<synchronous>, transform_indices = @transform_3, window_bounds = array<i64: 2, 128>}, {transform_indices = @transform_4, window_bounds = array<i64: 1, 64, 128>}]} {
    %c0 = arith.constant 0 : index
    %c0_0 = arith.constant 0 : index
    %c0_1 = arith.constant 0 : index
    %0 = vector.load %arg1[%c0, %c0_0, %c0_1] : memref<1x64x128xbf16, #tpu.memory_space<vmem>>, vector<1x64x128xbf16>
    %1 = vector.shape_cast %0 : vector<1x64x128xbf16> to vector<64x128xbf16>
    %2 = arith.extf %1 : vector<64x128xbf16> to vector<64x128xf32>
    %c0_2 = arith.constant 0 : index
    %c0_3 = arith.constant 0 : index
    %c0_4 = arith.constant 0 : index
    %3 = vector.load %arg2[%c0_2, %c0_3, %c0_4] : memref<1x64x128xbf16, #tpu.memory_space<vmem>>, vector<1x64x128xbf16>
    %4 = vector.shape_cast %3 : vector<1x64x128xbf16> to vector<64x128xbf16>
    %5 = arith.extf %4 : vector<64x128xbf16> to vector<64x128xf32>
    %c0_5 = arith.constant 0 : index
    %c0_6 = arith.constant 0 : index
    %6 = vector.load %arg3[%c0_5, %c0_6] : memref<2x128xf32, #tpu.memory_space<vmem>>, vector<1x128xf32>
    %7 = vector.broadcast %6 : vector<1x128xf32> to vector<64x128xf32>
    %8 = arith.mulf %2, %7 : vector<64x128xf32>
    %c0_7 = arith.constant 0 : index
    %c0_8 = arith.constant 0 : index
    %9 = vector.load %arg4[%c0_7, %c0_8] : memref<2x128xf32, #tpu.memory_space<vmem>>, vector<1x128xf32>
    %10 = vector.broadcast %9 : vector<1x128xf32> to vector<64x128xf32>
    %11 = arith.addf %8, %10 : vector<64x128xf32>
    %c1 = arith.constant 1 : index
    %c0_9 = arith.constant 0 : index
    %12 = vector.load %arg3[%c1, %c0_9] : memref<2x128xf32, #tpu.memory_space<vmem>>, vector<1x128xf32>
    %13 = vector.broadcast %12 : vector<1x128xf32> to vector<64x128xf32>
    %14 = arith.mulf %5, %13 : vector<64x128xf32>
    %c1_10 = arith.constant 1 : index
    %c0_11 = arith.constant 0 : index
    %15 = vector.load %arg4[%c1_10, %c0_11] : memref<2x128xf32, #tpu.memory_space<vmem>>, vector<1x128xf32>
    %16 = vector.broadcast %15 : vector<1x128xf32> to vector<64x128xf32>
    %17 = arith.addf %14, %16 : vector<64x128xf32>
    %cst = arith.constant 0.000000e+00 : f32
    %18 = vector.broadcast %cst : f32 to vector<64x128xf32>
    %19 = arith.maximumf %11, %18 : vector<64x128xf32>
    %20 = arith.addf %19, %17 : vector<64x128xf32>
    %cst_12 = arith.constant 0.000000e+00 : f32
    %21 = vector.broadcast %cst_12 : f32 to vector<64x128xf32>
    %22 = arith.maximumf %20, %21 : vector<64x128xf32>
    %c0_13 = arith.constant 0 : index
    %c0_14 = arith.constant 0 : index
    %c0_15 = arith.constant 0 : index
    %23 = vector.load %arg5[%c0_13, %c0_14, %c0_15] : memref<1x64x128xf32, #tpu.memory_space<vmem>>, vector<1x64x128xf32>
    %24 = vector.shape_cast %23 : vector<1x64x128xf32> to vector<64x128xf32>
    %25 = vector.shape_cast %22 : vector<64x128xf32> to vector<1x64x128xf32>
    tpu.vector_store %arg5[%c0_13, %c0_14, %c0_15], %25 {strides = array<i32>} : memref<1x64x128xf32, #tpu.memory_space<vmem>>, vector<1x64x128xf32>,
    return
  }
  func.func @transform_0(%arg0: i32) -> (i32, i32, i32) {
    %c0_i32 = arith.constant 0 : i32
    %c0_i32_0 = arith.constant 0 : i32
    %c0_i32_1 = arith.constant 0 : i32
    return %arg0, %c0_i32, %c0_i32_0 : i32, i32, i32
  }
  func.func @transform_1(%arg0: i32) -> (i32, i32, i32) {
    %c0_i32 = arith.constant 0 : i32
    %c0_i32_0 = arith.constant 0 : i32
    %c0_i32_1 = arith.constant 0 : i32
    return %arg0, %c0_i32, %c0_i32_0 : i32, i32, i32
  }
  func.func @transform_2(%arg0: i32) -> (i32, i32) {
    %c0_i32 = arith.constant 0 : i32
    %c0_i32_0 = arith.constant 0 : i32
    %c0_i32_1 = arith.constant 0 : i32
    return %c0_i32, %c0_i32_0 : i32, i32
  }
  func.func @transform_3(%arg0: i32) -> (i32, i32) {
    %c0_i32 = arith.constant 0 : i32
    %c0_i32_0 = arith.constant 0 : i32
    %c0_i32_1 = arith.constant 0 : i32
    return %c0_i32, %c0_i32_0 : i32, i32
  }
  func.func @transform_4(%arg0: i32) -> (i32, i32, i32) {
    %c0_i32 = arith.constant 0 : i32
    %c0_i32_0 = arith.constant 0 : i32
    %c0_i32_1 = arith.constant 0 : i32
    return %arg0, %c0_i32, %c0_i32_0 : i32, i32, i32
  }
}

</mosaic_0001>

<bundles_post_ra>
// kernel: conv_block_forward.3
= control target key start
LH: loop header
LB: loop body
LE: loop exit
PB: predicated region body
PF: predicated region fallthrough
CT: control target
= control target key end

     0   :  { %s500_s15 = smov 0   ;;  %s598_s0 = inlined_call_operand.vmem [shape: bf16[2,64,128], index: 0, kind: input, shape index: {}]   ;;  %s599_s1 = inlined_call_operand.vmem [shape: bf16[2,64,128], index: 1, kind: input, shape index: {}]   ;;  %s600_s2 = inlined_call_operand.vmem [shape: f32[2,128], index: 2, kind: input, shape index: {}]   ;;  %s601_s3 = inlined_call_operand.vmem [shape: f32[2,128], index: 3, kind: input, shape index: {}]   ;;  %s602_s4 = inlined_call_operand.vmem [shape: f32[2,64,128], index: 4, kind: output, shape index: {}]  }
   0x1 LB: > { %s401_s16 = sadd.s32 4294967295, %s473_s15   ;;  %p405_p0 = scmp.ge.s32.totalorder %s473_s15, 1  ;;  %s473_s15 = sphi %s500_s15, %s14_s15  }
   0x2   : > { %p172_p1 = scmp.lt.s32.totalorder %s473_s15, 3 }
   0x4   : > { %p173_p2 = pnand %p405_p0, %p172_p1 }
   0x5   : > { %p203_p3 = scmp.lt.s32.totalorder (!%p173_p2), %s401_s16, 1  ;;  %v524_v0 = vld [vmem:[%s600_s2] ss:$0 sm:$0xff] (!%p173_p2)  ;;  %v529_v1 = vld [vmem:[%s600_s2 + $0x1] ss:$0 sm:$0xff] (!%p173_p2) }
   0x6   : > { %176 = sbr.rel (%p173_p2) target bundleno = 42 (0x2a), region = 36  ;;  %v538_v10 = vld [vmem:[%s601_s3] ss:$0 sm:$0xff] (!%p173_p2)  ;;  %v543_v11 = vld [vmem:[%s601_s3 + $0x1] ss:$0 sm:$0xff] (!%p173_p2) }
   0xd   : > { %s604_s16 = smov (!%p203_p3, %s401_s16), 1 }
   0xe   : > { %s418_s17 = sshll.u32 %s604_s16, 5  ;;  %s420_s6 = sshll.u32 %s604_s16, 6 }
   0xf   : > { %s514_s20 = scalar_lea.vmem %s598_s0, %s418_s17  ;;  %s519_s23 = scalar_lea.vmem %s599_s1, %s418_s17 }
  0x10   : > { %v422_v2 = vld [vmem:[%s514_s20] sm:$0xff]   ;;  %v453_v4 = vld [vmem:[%s514_s20 + $0x8] sm:$0xff]   ;;  %v454_v24 = vld [vmem:[%s514_s20 + $0x10] sm:$0xff]   ;;  %s569_s9 = scalar_lea.vmem %s602_s4, %s420_s6 }
  0x11   : > { %v438_v3 = vld [vmem:[%s519_s23] sm:$0xff]   ;;  %v423_v5 = vunpack.c.l.bf16 %v422_v2  ;;  %v424_v7 = vunpack.c.h.bf16 %v422_v2  ;;  %v456_v9 = vld [vmem:[%s519_s23 + $0x8] sm:$0xff]   ;;  %v427_v12 = vunpack.c.l.bf16 %v453_v4  ;;  %v428_v14 = vunpack.c.h.bf16 %v453_v4  ;;  %v457_v25 = vld [vmem:[%s519_s23 + $0x10] sm:$0xff]  }
  0x12   : > { %v439_v6 = vunpack.c.l.bf16 %v438_v3  ;;  %v440_v8 = vunpack.c.h.bf16 %v438_v3  ;;  %v443_v13 = vunpack.c.l.bf16 %v456_v9  ;;  %v444_v15 = vunpack.c.h.bf16 %v456_v9  ;;  %v455_v50 = vld [vmem:[%s514_s20 + $0x18] sm:$0xff]  }
  0x13   : > { %v255_v16 = vmul.f32 %v423_v5, %v524_v0  ;;  %v256_v18 = vmul.f32 %v424_v7, %v524_v0  ;;  %v257_v20 = vmul.f32 %v427_v12, %v524_v0  ;;  %v258_v22 = vmul.f32 %v428_v14, %v524_v0  ;;  %v458_v51 = vld [vmem:[%s519_s23 + $0x18] sm:$0xff]  }
  0x14   : > { %v281_v17 = vmul.f32 %v439_v6, %v529_v1  ;;  %v282_v19 = vmul.f32 %v440_v8, %v529_v1  ;;  %v283_v21 = vmul.f32 %v443_v13, %v529_v1  ;;  %v284_v23 = vmul.f32 %v444_v15, %v529_v1 }
  0x15   : > { %v268_v26 = vadd.f32 %v538_v10, %v255_v16  ;;  %v269_v28 = vadd.f32 %v538_v10, %v256_v18  ;;  %v270_v30 = vadd.f32 %v538_v10, %v257_v20  ;;  %v271_v32 = vadd.f32 %v538_v10, %v258_v22 }
  0x16   : > { %v294_v27 = vadd.f32 %v543_v11, %v281_v17  ;;  %v295_v29 = vadd.f32 %v543_v11, %v282_v19  ;;  %v296_v31 = vadd.f32 %v543_v11, %v283_v21  ;;  %v297_v33 = vadd.f32 %v543_v11, %v284_v23 }
  0x17   : > { %v302_v34 = vmax.f32 %v268_v26, 0.0  ;;  %v303_v35 = vmax.f32 %v269_v28, 0.0  ;;  %v431_v36 = vunpack.c.l.bf16 %v454_v24  ;;  %v447_v37 = vunpack.c.l.bf16 %v457_v25 }
  0x18   : > { %v304_v38 = vmax.f32 %v270_v30, 0.0  ;;  %v305_v39 = vmax.f32 %v271_v32, 0.0  ;;  %v432_v40 = vunpack.c.h.bf16 %v454_v24  ;;  %v448_v41 = vunpack.c.h.bf16 %v457_v25 }
  0x19   : > { %v310_v42 = vadd.f32 %v302_v34, %v294_v27  ;;  %v311_v43 = vadd.f32 %v303_v35, %v295_v29  ;;  %v259_v44 = vmul.f32 %v431_v36, %v524_v0  ;;  %v285_v45 = vmul.f32 %v447_v37, %v529_v1 }
  0x1a   : > { %v312_v46 = vadd.f32 %v304_v38, %v296_v31  ;;  %v313_v47 = vadd.f32 %v305_v39, %v297_v33  ;;  %v260_v48 = vmul.f32 %v432_v40, %v524_v0  ;;  %v286_v49 = vmul.f32 %v448_v41, %v529_v1 }
  0x1b   : > { %v318_v52 = vmax.f32 %v310_v42, 0.0  ;;  %v319_v53 = vmax.f32 %v311_v43, 0.0  ;;  %v272_v54 = vadd.f32 %v538_v10, %v259_v44  ;;  %v298_v55 = vadd.f32 %v543_v11, %v285_v45 }
  0x1c   : > { %v320_v56 = vmax.f32 %v312_v46, 0.0  ;;  %v321_v57 = vmax.f32 %v313_v47, 0.0  ;;  %v273_v58 = vadd.f32 %v538_v10, %v260_v48  ;;  %v299_v59 = vadd.f32 %v543_v11, %v286_v49 }
  0x1d   : > { %326 = vst [vmem:[%s569_s9] sm:$0xff] %v318_v52  ;;  %327 = vst [vmem:[%s569_s9 + $0x8] sm:$0xff] %v319_v53  ;;  %v306_v60 = vmax.f32 %v272_v54, 0.0  ;;  %v435_v61 = vunpack.c.l.bf16 %v455_v50  ;;  %v451_v62 = vunpack.c.l.bf16 %v458_v51  ;;  %v436_v63 = vunpack.c.h.bf16 %v455_v50 }
  0x1e   : > { %328 = vst [vmem:[%s569_s9 + $0x10] sm:$0xff] %v320_v56  ;;  %329 = vst [vmem:[%s569_s9 + $0x18] sm:$0xff] %v321_v57  ;;  %v307_v2 = vmax.f32 %v273_v58, 0.0  ;;  %v452_v3 = vunpack.c.h.bf16 %v458_v51 }
  0x1f   : > { %v314_v4 = vadd.f32 %v306_v60, %v298_v55  ;;  %v261_v5 = vmul.f32 %v435_v61, %v524_v0  ;;  %v287_v6 = vmul.f32 %v451_v62, %v529_v1  ;;  %v262_v7 = vmul.f32 %v436_v63, %v524_v0 }
  0x20   : > { %v315_v8 = vadd.f32 %v307_v2, %v299_v59  ;;  %v288_v9 = vmul.f32 %v452_v3, %v529_v1 }
  0x21   : > { %v322_v12 = vmax.f32 %v314_v4, 0.0  ;;  %v274_v13 = vadd.f32 %v538_v10, %v261_v5  ;;  %v300_v14 = vadd.f32 %v543_v11, %v287_v6  ;;  %v275_v15 = vadd.f32 %v538_v10, %v262_v7 }
  0x22   : > { %v323_v16 = vmax.f32 %v315_v8, 0.0  ;;  %v301_v17 = vadd.f32 %v543_v11, %v288_v9 }
  0x23   : > { %330 = vst [vmem:[%s569_s9 + $0x20] sm:$0xff] %v322_v12  ;;  %v308_v18 = vmax.f32 %v274_v13, 0.0  ;;  %v309_v19 = vmax.f32 %v275_v15, 0.0 }
  0x24   : > { %331 = vst [vmem:[%s569_s9 + $0x28] sm:$0xff] %v323_v16 }
  0x25   : > { %v316_v0 = vadd.f32 %v308_v18, %v300_v14  ;;  %v317_v20 = vadd.f32 %v309_v19, %v301_v17 }
  0x27   : > { %v324_v21 = vmax.f32 %v316_v0, 0.0  ;;  %v325_v22 = vmax.f32 %v317_v20, 0.0 }
  0x29   : > { %332 = vst [vmem:[%s569_s9 + $0x30] sm:$0xff] %v324_v21  ;;  %333 = vst [vmem:[%s569_s9 + $0x38] sm:$0xff] %v325_v22 }
  0x2a PF: > { %s14_s15 = sadd.s32 1, %s473_s15  }
  0x2b   : > { %p11_p4 = scmp.ge.s32.totalorder %s14_s15, 4  }
  0x2d   :  { %13 = sbr.rel (!%p11_p4) target bundleno = 1 (0x1), region = 69 }

// kernel: conv_block_forward.2
= control target key start
LH: loop header
LB: loop body
LE: loop exit
PB: predicated region body
PF: predicated region fallthrough
CT: control target
= control target key end

     0   :  { %s3568_s21 = smov 0   ;;  %s3986_s0 = inlined_call_operand.vmem [shape: bf16[2,4,9,9,128], index: 0, kind: input, shape index: {}]   ;;  %s3987_s1 = inlined_call_operand.vmem [shape: bf16[9,128,128], index: 1, kind: input, shape index: {}]   ;;  %s3988_s2 = inlined_call_operand.vmem [shape: bf16[128,128], index: 2, kind: input, shape index: {}]   ;;  %s3989_s3 = inlined_call_operand.vmem [shape: bf16[2,64,128], index: 3, kind: output, shape index: {0}]   ;;  %s3990_s4 = inlined_call_operand.vmem [shape: bf16[2,64,128], index: 4, kind: output, shape index: {1}]   ;;  %s3991_s5 = inlined_call_operand.vmem [shape: f32[2,2,128], index: 5, kind: output, shape index: {2}]   ;;  %s3992_s6 = inlined_call_operand.vmem [shape: f32[2,2,128], index: 6, kind: output, shape index: {3}]  }
   0x1 LB: > { %s2574_s22 = sadd.s32 4294967295, %s3531_s21   ;;  %p2578_p0 = scmp.ge.s32.totalorder %s3531_s21, 1  ;;  %s3531_s21 = sphi %s3568_s21, %s17_s21  }
   0x2   : > { %p219_p1 = scmp.lt.s32.totalorder %s3531_s21, 3 }
   0x4   : > { %p220_p2 = pnand %p2578_p0, %p219_p1 }
   0x5   : > { %v3417_v0 = vld [vmem:[%s3987_s1 + $0x40] sm:$0xff] (!%p220_p2)   ;;  %p262_p3 = scmp.lt.s32.totalorder (!%p220_p2), %s2574_s22, 1  ;;  %v3419_v2 = vld [vmem:[%s3987_s1 + $0x48] sm:$0xff] (!%p220_p2)   ;;  %v3421_v4 = vld [vmem:[%s3987_s1 + $0x50] sm:$0xff] (!%p220_p2)   ;;  %vm626_vm0 = vsmask.f32 (!%p220_p2), 3328 }
   0x6   : > { %223 = sbr.rel (%p220_p2) target bundleno = 413 (0x19d), region = 32  ;;  %v3418_v1 = vld [vmem:[%s3987_s1 + $0x100] sm:$0xff] (!%p220_p2)   ;;  %3104 = vmatprep.subr.bf16.mxu1 (!%p220_p2), %v3417_v0  ;;  %v3420_v3 = vld [vmem:[%s3987_s1 + $0x108] sm:$0xff] (!%p220_p2)   ;;  %v3422_v5 = vld [vmem:[%s3987_s1 + $0x110] sm:$0xff] (!%p220_p2)   ;;  %vm627_vm1 = vsmask.f32 (!%p220_p2), 7440 }
   0x7   : > { %3200 = vmatprep.subr.bf16.mxu0 (!%p220_p2), %v3418_v1  ;;  %3105 = vmatpush3.bf16.msra.mxu1 (!%p220_p2), %v3417_v0  ;;  %v3423_v6 = vld [vmem:[%s3987_s1 + $0x58] sm:$0xff] (!%p220_p2)   ;;  %v3425_v8 = vld [vmem:[%s3987_s1 + $0x60] sm:$0xff] (!%p220_p2)   ;;  %v3427_v10 = vld [vmem:[%s3987_s1 + $0x68] sm:$0xff] (!%p220_p2)  }
   0x8   : > { %3201 = vmatpush3.bf16.msra.mxu0 (!%p220_p2), %v3418_v1  ;;  %3106 = vmatprep.subr.bf16.mxu1 (!%p220_p2), %v3419_v2  ;;  %v3424_v7 = vld [vmem:[%s3987_s1 + $0x118] sm:$0xff] (!%p220_p2)   ;;  %v3426_v9 = vld [vmem:[%s3987_s1 + $0x120] sm:$0xff] (!%p220_p2)   ;;  %v3428_v12 = vld [vmem:[%s3987_s1 + $0x128] sm:$0xff] (!%p220_p2)  }
   0x9   : > { %3202 = vmatprep.subr.bf16.mxu0 (!%p220_p2), %v3420_v3  ;;  %v3429_v14 = vld [vmem:[%s3987_s1 + $0x70] sm:$0xff] (!%p220_p2)   ;;  %v3431_v16 = vld [vmem:[%s3987_s1 + $0x78] sm:$0xff] (!%p220_p2)   ;;  %v3434_v18 = vld [vmem:[%s3987_s1] sm:$0xff] (!%p220_p2)  }
   0xa   : > { %v3430_v15 = vld [vmem:[%s3987_s1 + $0x130] sm:$0xff] (!%p220_p2)   ;;  %v3432_v17 = vld [vmem:[%s3987_s1 + $0x138] sm:$0xff] (!%p220_p2)   ;;  %v3436_v19 = vld [vmem:[%s3987_s1 + $0x140] sm:$0xff] (!%p220_p2)  }
   0xb   : > { %3107 = vmatpush3.bf16.msra.mxu1 (!%p220_p2), %v3419_v2  ;;  %v3439_v22 = vld [vmem:[%s3987_s1 + $0x8] sm:$0xff] (!%p220_p2)   ;;  %v3441_v26 = vld [vmem:[%s3987_s1 + $0x10] sm:$0xff] (!%p220_p2)   ;;  %v3443_v28 = vld [vmem:[%s3987_s1 + $0x18] sm:$0xff] (!%p220_p2)  }
   0xc   : > { %3203 = vmatpush3.bf16.msra.mxu0 (!%p220_p2), %v3420_v3  ;;  %3108 = vmatprep.subr.bf16.mxu1 (!%p220_p2), %v3421_v4  ;;  %v3440_v23 = vld [vmem:[%s3987_s1 + $0x148] sm:$0xff] (!%p220_p2)   ;;  %v3442_v27 = vld [vmem:[%s3987_s1 + $0x150] sm:$0xff] (!%p220_p2)   ;;  %v3444_v31 = vld [vmem:[%s3987_s1 + $0x158] sm:$0xff] (!%p220_p2)  }
   0xd   : > { %s3996_s22 = smov (!%p262_p3, %s2574_s22), 1  ;;  %3204 = vmatprep.subr.bf16.mxu0 %v3422_v5  ;;  %v3445_v38 = vld [vmem:[%s3987_s1 + $0x20] sm:$0xff]   ;;  %v3447_v47 = vld [vmem:[%s3987_s1 + $0x28] sm:$0xff]   ;;  %vm3683_vm2 = vmor %vm626_vm0, %vm627_vm1 }
   0xe   : > { %s3408_s15 = smul.u32 288, %s3996_s22  ;;  %v3446_v43 = vld [vmem:[%s3987_s1 + $0x160] sm:$0xff]   ;;  %v3448_v50 = vld [vmem:[%s3987_s1 + $0x168] sm:$0xff]   ;;  %v3450_v2 = vld [vmem:[%s3987_s1 + $0x30] sm:$0xff]   ;;  %s2584_s23 = sshll.u32 %s3996_s22, 1 }
   0xf   : > { %3109 = vmatpush3.bf16.msra.mxu1 %v3421_v4  ;;  %s280_s27 = scalar_lea.vmem %s3991_s5, %s2584_s23 }
  0x10   : > { %3205 = vmatpush3.bf16.msra.mxu0 %v3422_v5  ;;  %3110 = vmatprep.subr.bf16.mxu1 %v3423_v6  ;;  %s3612_s24 = scalar_lea.vmem %s3986_s0, %s3408_s15  ;;  %s2920_s15 = sshll.u32 %s3996_s22, 5 }
  0x11   : > { %3206 = vmatprep.subr.bf16.mxu0 %v3424_v7  ;;  %v3433_v11 = vld [vmem:[%s3612_s24 + $0x48] ss:$8 sps:$4 sm:$0xff]   ;;  %v3435_v13 = vld [vmem:[%s3612_s24 + $0xd8] ss:$8 sps:$4 sm:$0xff]   ;;  %v2735_v34 = vld [vmem:[%s3612_s24 + $0x94] sm:$0x1]  ;;  %s3965_s20 = scalar_lea.vmem %s3989_s3, %s2920_s15  ;;  %s284_s22 = scalar_lea.vmem %s3992_s6, %s2584_s23 }
  0x12   : > { %3120 = vmatprep.mubr.bf16.mxu1 %v3433_v11  ;;  %3216 = vmatprep.mubr.bf16.mxu0 %v3435_v13  ;;  %v3437_v20 = vld [vmem:[%s3612_s24 + $0x58] ss:$8 sps:$4 sm:$0xff]   ;;  %v3438_v21 = vld [vmem:[%s3612_s24 + $0xe8] ss:$8 sps:$4 sm:$0xff]   ;;  %v2737_v39 = vld [vmem:[%s3612_s24 + $0x9c] sm:$0x1] }
  0x13   : > { %3111 = vmatpush3.bf16.msra.mxu1 %v3423_v6  ;;  %v3449_v24 = vld [vmem:[%s3612_s24 + $0x68] ss:$8 sps:$4 sm:$0xff]   ;;  %v3451_v25 = vld [vmem:[%s3612_s24 + $0xf8] ss:$8 sps:$4 sm:$0xff]   ;;  %v1263_v40 = vshll.u32 %v2735_v34, 16  ;;  %v1277_v46 = vshll.u32 %v2737_v39, 16 }
  0x14   : > { %3207 = vmatpush3.bf16.msra.mxu0 %v3424_v7  ;;  %3112 = vmatprep.subr.bf16.mxu1 %v3425_v8  ;;  %v3453_v29 = vld [vmem:[%s3612_s24 + $0x78] ss:$8 sps:$4 sm:$0xff]   ;;  %v3454_v30 = vld [vmem:[%s3612_s24 + $0x108] ss:$8 sps:$4 sm:$0xff]   ;;  %v2739_v57 = vld [vmem:[%s3612_s24 + $0xa4] sm:$0x1] }
  0x15   : > { %3208 = vmatprep.subr.bf16.mxu0 %v3426_v9  ;;  %v3457_v32 = vld [vmem:[%s3612_s24] ss:$8 sps:$4 sm:$0xff]   ;;  %v2734_v33 = vld [vmem:[%s3612_s24 + $0x90] sm:$0xf]  ;;  %v2736_v35 = vld [vmem:[%s3612_s24 + $0x98] sm:$0xf] }
  0x16   : > { %v1254_v36 = vshrl.u32 %v2734_v33, 16  ;;  %v1257_v37 = vshll.u32 %v2734_v33, 16  ;;  %v1268_v41 = vshrl.u32 %v2736_v35, 16  ;;  %v1271_v42 = vshll.u32 %v2736_v35, 16  ;;  %v2738_v56 = vld [vmem:[%s3612_s24 + $0xa0] sm:$0xf] }
  0x17   : > { %3113 = vmatpush3.bf16.msra.mxu1 %v3425_v8  ;;  %v1265_v52 = vrot.slane %v1263_v40, 5  ;;  %v1279_v55 = vrot.slane %v1277_v46, 5  ;;  %v2740_v59 = vld [vmem:[%s3612_s24 + $0xa8] sm:$0xf]  ;;  %v2741_v60 = vld [vmem:[%s3612_s24 + $0xac] sm:$0x1] }
  0x18   : > { %3209 = vmatpush3.bf16.msra.mxu0 %v3426_v9  ;;  %3114 = vmatprep.subr.bf16.mxu1 %v3427_v10  ;;  %v1256_v44 = vrot.slane %v1254_v36, 4  ;;  %v1259_v45 = vrot.slane %v1257_v37, 5  ;;  %v1270_v48 = vrot.slane %v1268_v41, 4  ;;  %v1273_v49 = vrot.slane %v1271_v42, 5  ;;  %v3452_v6 = vld [vmem:[%s3987_s1 + $0x170] sm:$0xff]  }
  0x19   : > { %3210 = vmatprep.subr.bf16.mxu0 %v3428_v12  ;;  %v1282_v61 = vshrl.u32 %v2738_v56, 16  ;;  %v1285_v63 = vshll.u32 %v2738_v56, 16  ;;  %v1291_v0 = vshll.u32 %v2739_v57, 16  ;;  %v1296_v1 = vshrl.u32 %v2740_v59, 16  ;;  %v3471_v37 = vld [vmem:[%s3612_s24 + $0x20] ss:$8 sps:$4 sm:$0xff]  }
  0x1a   : > { %v1260_v51 = vor.u32 %v1259_v45, %v1256_v44  ;;  %v1274_v54 = vor.u32 %v1273_v49, %v1270_v48  ;;  %v1299_v5 = vshll.u32 %v2740_v59, 16  ;;  %v3474_v48 = vld [vmem:[%s3612_s24 + $0x30] ss:$8 sps:$4 sm:$0xff]   ;;  %v2746_v49 = vld [vmem:[%s3612_s24 + $0xc0] sm:$0xf] }
  0x1b   : > { %3115 = vmatpush3.bf16.msra.mxu1 %v3427_v10  ;;  %v1284_v4 = vrot.slane %v1282_v61, 4  ;;  %v1287_v8 = vrot.slane %v1285_v63, 5  ;;  %v1298_v9 = vrot.slane %v1296_v1, 4  ;;  %v1305_v10 = vshll.u32 %v2741_v60, 16  ;;  %v3465_v59 = vld [vmem:[%s3987_s1 + $0x98] sm:$0xff]  }
  0x1c   : > { %3211 = vmatpush3.bf16.msra.mxu0 %v3428_v12  ;;  %3116 = vmatprep.subr.bf16.mxu1 %v3429_v14  ;;  %v1261_v58 = vrot.slane %v1260_v51, 4  ;;  %v1275_v62 = vrot.slane %v1274_v54, 4  ;;  %v1293_v12 = vrot.slane %v1291_v0, 5  ;;  %v1301_v13 = vrot.slane %v1299_v5, 5  ;;  %v2748_v51 = vld [vmem:[%s3612_s24 + $0xc8] sm:$0xf] }
  0x1d   : > { %3212 = vmatprep.subr.bf16.mxu0 %v3430_v15  ;;  %v1338_v56 = vshrl.u32 %v2746_v49, 16  ;;  %v1341_v57 = vshll.u32 %v2746_v49, 16  ;;  %v1352_v61 = vshrl.u32 %v2748_v51, 16 }
  0x1e   : > { %v1266_v3 = vsel %vm3683_vm2, %v1261_v58, %v1265_v52  ;;  %v1280_v7 = vsel %vm3683_vm2, %v1275_v62, %v1279_v55  ;;  %v3464_v52 = vld [vmem:[%s3987_s1 + $0x190] sm:$0xff]   ;;  %v2749_v55 = vld [vmem:[%s3612_s24 + $0xcc] sm:$0x1]  ;;  %v1355_v62 = vshll.u32 %v2748_v51, 16 }
  0x1f   : > { %3117 = vmatpush3.bf16.msra.mxu1 %v3429_v14  ;;  %v2766_v11 = vcombine.low %v1266_v3, %v1280_v7  ;;  %v3455_v14 = vld [vmem:[%s3987_s1 + $0x38] sm:$0xff]   ;;  %v1361_v63 = vshll.u32 %v2749_v55, 16  ;;  %v1340_v1 = vrot.slane %v1338_v56, 4 }
  0x20   : > { %3213 = vmatpush3.bf16.msra.mxu0 %v3430_v15  ;;  %3118 = vmatprep.subr.bf16.mxu1 %v3431_v16  ;;  %v1288_v15 = vor.u32 %v1287_v8, %v1284_v4  ;;  %v3466_v4 = vld [vmem:[%s3987_s1 + $0x198] sm:$0xff]   ;;  %v1357_v7 = vrot.slane %v1355_v62, 5 }
  0x21   : > { %3214 = vmatprep.subr.bf16.mxu0 %v3432_v17  ;;  %v1363_v8 = vrot.slane %v1361_v63, 5 }
  0x23   : > { %3119 = vmatpush3.bf16.msra.mxu1 %v3431_v16  ;;  %v1302_v16 = vor.u32 %v1301_v13, %v1298_v9  ;;  %v3467_v13 = vld [vmem:[%s3987_s1 + $0xa0] sm:$0xff]  }
  0x24   : > { %3215 = vmatpush3.bf16.msra.mxu0 %v3432_v17  ;;  %3128 = vmatprep.subr.bf16.mxu1 %v3434_v18  ;;  %v1289_v17 = vrot.slane %v1288_v15, 4 }
  0x25   : > { %3224 = vmatprep.subr.bf16.mxu0 %v3436_v19 }
  0x26   : > { %3121 = vmatmul.mubr.bf16.vlgmr.msra.gmra.mrb[0].mxu1 %v3437_v20  ;;  %v1303_v20 = vrot.slane %v1302_v16, 4  ;;  %v612_v16 = vld [vmem:[%s3612_s24 + $0x8] sm:$0xf] }
  0x27   : > { %3129 = vmatpush3.bf16.msra.mxu1 %v3434_v18  ;;  %3217 = vmatmul.mubr.bf16.vlgmr.msra.gmra.mrb[0].mxu0 %v3438_v21  ;;  %v1307_v18 = vrot.slane %v1305_v10, 5  ;;  %v3458_v21 = vld [vmem:[%s3987_s1 + $0x80] sm:$0xff]  }
  0x28   : > { %3225 = vmatpush3.bf16.msra.mxu0 %v3436_v19  ;;  %3130 = vmatprep.subr.bf16.mxu1 %v3439_v22  ;;  %v3456_v19 = vld [vmem:[%s3987_s1 + $0x178] sm:$0xff]  }
  0x29   : > { %3226 = vmatprep.subr.bf16.mxu0 %v3440_v23  ;;  %3124 = vmatprep.mubr.bf16.mxu1 %v3449_v24  ;;  %v3459_v24 = vld [vmem:[%s3987_s1 + $0x180] sm:$0xff]  }
  0x2a   : > { %3220 = vmatprep.mubr.bf16.mxu0 %v3451_v25  ;;  %v3460_v25 = vld [vmem:[%s3612_s24 + $0x10] ss:$8 sps:$4 sm:$0xff]  }
  0x2b   : > { %3131 = vmatpush3.bf16.msra.mxu1 %v3439_v22  ;;  %v1294_v22 = vsel %vm3683_vm2, %v1289_v17, %v1293_v12  ;;  %v611_v12 = vld [vmem:[%s3612_s24 + $0x4] sm:$0x1]  ;;  %v613_v17 = vld [vmem:[%s3612_s24 + $0xc] sm:$0x1] }
  0x2c   : > { %3227 = vmatpush3.bf16.msra.mxu0 %v3440_v23  ;;  %3132 = vmatprep.subr.bf16.mxu1 %v3441_v26  ;;  %v1308_v23 = vsel %vm3683_vm2, %v1303_v20, %v1307_v18 }
  0x2d   : > { %3228 = vmatprep.subr.bf16.mxu0 %v3442_v27 }
  0x2e   : > { %3125 = vmatmul.mubr.bf16.gmra.mrb[4].mxu1 %v3453_v29  ;;  %v3462_v29 = vld [vmem:[%s3987_s1 + $0x188] sm:$0xff]  }
  0x2f   : > { %3133 = vmatpush3.bf16.msra.mxu1 %v3441_v26  ;;  %3221 = vmatmul.mubr.bf16.gmra.mrb[4].mxu0 %v3454_v30  ;;  %v3461_v26 = vld [vmem:[%s3987_s1 + $0x88] sm:$0xff]   ;;  %v2743_v30 = vld [vmem:[%s3612_s24 + $0xb4] sm:$0x1] }
  0x30   : > { %3229 = vmatpush3.bf16.msra.mxu0 %v3442_v27  ;;  %3134 = vmatprep.subr.bf16.mxu1 %v3443_v28  ;;  %v2742_v27 = vld [vmem:[%s3612_s24 + $0xb0] sm:$0xf]  ;;  %v1319_v35 = vshll.u32 %v2743_v30, 16 }
  0x31   : > { %3230 = vmatprep.subr.bf16.mxu0 %v3444_v31  ;;  %3144 = vmatprep.mubr.bf16.mxu1 %v3457_v32  ;;  %v2745_v32 = vld [vmem:[%s3612_s24 + $0xbc] sm:$0x1]  ;;  %v1310_v33 = vshrl.u32 %v2742_v27, 16  ;;  %v1313_v34 = vshll.u32 %v2742_v27, 16  ;;  %v653_v27 = vshll.u32 %v613_v17, 16 }
  0x32   : > { %3240 = vmatprep.mubr.bf16.mxu0 %v2766_v11  ;;  %v1333_v39 = vshll.u32 %v2745_v32, 16  ;;  %v1321_v44 = vrot.slane %v1319_v35, 5  ;;  %v610_v11 = vld [vmem:[%s3612_s24] sm:$0xf]  ;;  %v3469_v32 = vld [vmem:[%s3987_s1 + $0xa8] sm:$0xff]  }
  0x33   : > { %3135 = vmatpush3.bf16.msra.mxu1 %v3443_v28  ;;  %v2767_v28 = vcombine.low %v1294_v22, %v1308_v23  ;;  %v1312_v40 = vrot.slane %v1310_v33, 4  ;;  %v1315_v41 = vrot.slane %v1313_v34, 5  ;;  %v630_v18 = vshrl.u32 %v610_v11, 16  ;;  %v621_v17 = vld [vmem:[%s3612_s24 + $0x2c] sm:$0x1] }
  0x34   : > { %3231 = vmatpush3.bf16.msra.mxu0 %v3444_v31  ;;  %3136 = vmatprep.subr.bf16.mxu1 %v3445_v38  ;;  %v2744_v31 = vld [vmem:[%s3612_s24 + $0xb8] sm:$0xf]  ;;  %v1335_v46 = vrot.slane %v1333_v39, 5  ;;  %v644_v22 = vshrl.u32 %v612_v16, 16  ;;  %v647_v23 = vshll.u32 %v612_v16, 16 }
  0x35   : > { %3232 = vmatprep.subr.bf16.mxu0 %v3446_v43  ;;  %v1324_v36 = vshrl.u32 %v2744_v31, 16  ;;  %v620_v16 = vld [vmem:[%s3612_s24 + $0x28] sm:$0xf] }
  0x36   : > { %v646_v30 = vrot.slane %v644_v22, 4  ;;  %v700_v22 = vshrl.u32 %v620_v16, 16 }
  0x37   : > { %3137 = vmatpush3.bf16.msra.mxu1 %v3445_v38  ;;  %v1327_v38 = vshll.u32 %v2744_v31, 16  ;;  %v1326_v42 = vrot.slane %v1324_v36, 4  ;;  %v649_v31 = vrot.slane %v647_v23, 5  ;;  %v655_v36 = vrot.slane %v653_v27, 5  ;;  %v622_v23 = vld [vmem:[%s3612_s24 + $0x30] sm:$0xf] }
  0x38   : > { %3233 = vmatpush3.bf16.msra.mxu0 %v3446_v43  ;;  %3138 = vmatprep.subr.bf16.mxu1 %v3447_v47  ;;  %v3463_v43 = vld [vmem:[%s3987_s1 + $0x90] sm:$0xff]   ;;  %v624_v27 = vld [vmem:[%s3612_s24 + $0x38] sm:$0xf] }
  0x39   : > { %3234 = vmatprep.subr.bf16.mxu0 %v3448_v50  ;;  %v1329_v45 = vrot.slane %v1327_v38, 5  ;;  %v3470_v38 = vld [vmem:[%s3987_s1 + $0x1a8] sm:$0xff]  }
  0x3b   : > { %3139 = vmatpush3.bf16.msra.mxu1 %v3447_v47  ;;  %v1316_v47 = vor.u32 %v1315_v41, %v1312_v40  ;;  %v1330_v54 = vor.u32 %v1329_v45, %v1326_v42  ;;  %v650_v40 = vor.u32 %v649_v31, %v646_v30  ;;  %v614_v41 = vld [vmem:[%s3612_s24 + $0x10] sm:$0xf]  ;;  %v702_v31 = vrot.slane %v700_v22, 4  ;;  %v2850_v22 = vld [vmem:[%s3612_s24 + $0x8] sm:$0xf] }
  0x3c   : > { %3235 = vmatpush3.bf16.msra.mxu0 %v3448_v50  ;;  %3140 = vmatprep.subr.bf16.mxu1 %v3450_v2  ;;  %v2747_v50 = vld [vmem:[%s3612_s24 + $0xc4] sm:$0x1]  ;;  %v658_v45 = vshrl.u32 %v614_v41, 16 }
  0x3d   : > { %3236 = vmatprep.subr.bf16.mxu0 %v3452_v6  ;;  %v1347_v58 = vshll.u32 %v2747_v50, 16  ;;  %v1317_v60 = vrot.slane %v1316_v47, 4  ;;  %v1331_v0 = vrot.slane %v1330_v54, 4  ;;  %v617_v47 = vld [vmem:[%s3612_s24 + $0x1c] sm:$0x1] }
  0x3f   : > { %3141 = vmatpush3.bf16.msra.mxu1 %v3450_v2  ;;  %v1343_v2 = vrot.slane %v1341_v57, 5  ;;  %v1349_v3 = vrot.slane %v1347_v58, 5  ;;  %v1322_v5 = vsel %vm3683_vm2, %v1317_v60, %v1321_v44  ;;  %v1336_v9 = vsel %vm3683_vm2, %v1331_v0, %v1335_v46  ;;  %v616_v44 = vld [vmem:[%s3612_s24 + $0x18] sm:$0xf]  ;;  %v3473_v60 = vld [vmem:[%s3987_s1 + $0x1b0] sm:$0xff]  }
  0x40   : > { %3237 = vmatpush3.bf16.msra.mxu0 %v3452_v6  ;;  %3142 = vmatprep.subr.bf16.mxu1 %v3455_v14  ;;  %v1354_v6 = vrot.slane %v1352_v61, 4  ;;  %v651_v46 = vrot.slane %v650_v40, 4  ;;  %v672_v50 = vshrl.u32 %v616_v44, 16  ;;  %v675_v54 = vshll.u32 %v616_v44, 16 }
  0x41   : > { %3238 = vmatprep.subr.bf16.mxu0 %v3456_v19  ;;  %v1344_v10 = vor.u32 %v1343_v2, %v1340_v1  ;;  %v681_v58 = vshll.u32 %v617_v47, 16  ;;  %v728_v40 = vshrl.u32 %v624_v27, 16 }
  0x42   : > { %v1358_v15 = vor.u32 %v1357_v7, %v1354_v6  ;;  %v656_v55 = vsel %vm3683_vm2, %v651_v46, %v655_v36  ;;  %v674_v57 = vrot.slane %v672_v50, 4  ;;  %v677_v63 = vrot.slane %v675_v54, 5  ;;  %v3476_v6 = vld [vmem:[%s3987_s1 + $0x1b8] sm:$0xff]   ;;  %v3477_v7 = vld [vmem:[%s3987_s1 + $0xc0] sm:$0xff]  }
  0x43   : > { %3143 = vmatpush3.bf16.msra.mxu1 %v3455_v14  ;;  %v2768_v14 = vcombine.low %v1322_v5, %v1336_v9  ;;  %v1345_v20 = vrot.slane %v1344_v10, 4  ;;  %v3479_v10 = vld [vmem:[%s3987_s1 + $0x1c0] sm:$0xff]   ;;  %v717_v36 = vshll.u32 %v622_v23, 16 }
  0x44   : > { %3239 = vmatpush3.bf16.msra.mxu0 %v3456_v19  ;;  %3152 = vmatprep.subr.bf16.mxu1 %v3458_v21  ;;  %v633_v19 = vshll.u32 %v610_v11, 16  ;;  %v678_v1 = vor.u32 %v677_v63, %v674_v57  ;;  %v3480_v11 = vld [vmem:[%s3612_s24 + $0x18] ss:$8 sps:$4 sm:$0xff]  }
  0x45   : > { %3248 = vmatprep.subr.bf16.mxu0 %v3459_v24 }
  0x46   : > { %3145 = vmatmul.mubr.bf16.vlgmr.msra.gmra.mrb[0].mxu1 %v3460_v25  ;;  %v632_v25 = vrot.slane %v630_v18, 4  ;;  %v679_v5 = vrot.slane %v678_v1, 4  ;;  %v3482_v18 = vld [vmem:[%s3987_s1 + $0x1c8] sm:$0xff]   ;;  %v3487_v1 = vld [vmem:[%s3987_s1 + $0xe0] sm:$0xff]  }
  0x47   : > { %3153 = vmatpush3.bf16.msra.mxu1 %v3458_v21  ;;  %3241 = vmatmul.mubr.bf16.vlgmr.msra.gmra.mrb[0].mxu0 %v2767_v28  ;;  %v639_v21 = vshll.u32 %v611_v12, 16  ;;  %v3468_v28 = vld [vmem:[%s3987_s1 + $0x1a0] sm:$0xff]  }
  0x48   : > { %3249 = vmatpush3.bf16.msra.mxu0 %v3459_v24  ;;  %3154 = vmatprep.subr.bf16.mxu1 %v3461_v26  ;;  %v1359_v24 = vrot.slane %v1358_v15, 4  ;;  %v618_v12 = vld [vmem:[%s3612_s24 + $0x20] sm:$0xf]  ;;  %v619_v15 = vld [vmem:[%s3612_s24 + $0x24] sm:$0x1] }
  0x49   : > { %3250 = vmatprep.subr.bf16.mxu0 %v3462_v29  ;;  %3148 = vmatprep.mubr.bf16.mxu1 %v3471_v37  ;;  %v641_v35 = vrot.slane %v639_v21, 5  ;;  %v3478_v37 = vld [vmem:[%s3612_s24 + $0x8] ss:$8 sps:$4 sm:$0xff]   ;;  %v695_v21 = vshll.u32 %v619_v15, 16  ;;  %v3501_v15 = vld [vmem:[%s3988_s2] sm:$0xff]  }
  0x4a   : > { %3244 = vmatprep.mubr.bf16.mxu0 %v2768_v14  ;;  %v1364_v33 = vsel %vm3683_vm2, %v1359_v24, %v1363_v8  ;;  %v3481_v14 = vld [vmem:[%s3987_s1 + $0xc8] sm:$0xff]   ;;  %v703_v24 = vshll.u32 %v620_v16, 16  ;;  %v3500_v16 = vld [vmem:[%s3987_s1 + $0x200] sm:$0xff]  }
  0x4b   : > { %3155 = vmatpush3.bf16.msra.mxu1 %v3461_v26  ;;  %v635_v26 = vrot.slane %v633_v19, 5  ;;  %v686_v19 = vshrl.u32 %v618_v12, 16  ;;  %v697_v30 = vrot.slane %v695_v21, 5  ;;  %v3515_v21 = vld [vmem:[%s3612_s24 + $0x70] ss:$8 sps:$4 sm:$0xff]  }
  0x4c   : > { %3251 = vmatpush3.bf16.msra.mxu0 %v3462_v29  ;;  %3156 = vmatprep.subr.bf16.mxu1 %v3463_v43  ;;  %v1350_v29 = vsel %vm3683_vm2, %v1345_v20, %v1349_v3  ;;  %v683_v3 = vrot.slane %v681_v58, 5  ;;  %v689_v20 = vshll.u32 %v618_v12, 16  ;;  %v3485_v58 = vld [vmem:[%s3987_s1 + $0xd8] sm:$0xff]  }
  0x4d   : > { %3252 = vmatprep.subr.bf16.mxu0 %v3464_v52  ;;  %v636_v34 = vor.u32 %v635_v26, %v632_v25  ;;  %v2769_v39 = vcombine.low %v1350_v29, %v1364_v33  ;;  %v709_v25 = vshll.u32 %v621_v17, 16  ;;  %v623_v26 = vld [vmem:[%s3612_s24 + $0x34] sm:$0x1]  ;;  %v705_v33 = vrot.slane %v703_v24, 5  ;;  %v3495_v12 = vld [vmem:[%s3987_s1 + $0xf8] sm:$0xff]  }
  0x4e   : > { %3149 = vmatmul.mubr.bf16.gmra.mrb[4].mxu1 %v3474_v48  ;;  %v661_v48 = vshll.u32 %v614_v41, 16  ;;  %v684_v9 = vsel %vm3683_vm2, %v679_v5, %v683_v3  ;;  %v691_v29 = vrot.slane %v689_v20, 5  ;;  %v731_v41 = vshll.u32 %v624_v27, 16  ;;  %v3488_v5 = vld [vmem:[%s3987_s1 + $0x1e0] sm:$0xff]   ;;  %v3505_v20 = vld [vmem:[%s3612_s24 + $0xb0] ss:$8 sps:$4 sm:$0xff]  }
  0x4f   : > { %3157 = vmatpush3.bf16.msra.mxu1 %v3463_v43  ;;  %v637_v42 = vrot.slane %v636_v34, 4  ;;  %v615_v43 = vld [vmem:[%s3612_s24 + $0x14] sm:$0x1]  ;;  %3245 = vmatmul.mubr.bf16.gmra.mrb[4].mxu0 %v2769_v39  ;;  %v711_v34 = vrot.slane %v709_v25, 5  ;;  %v723_v39 = vshll.u32 %v623_v26, 16  ;;  %v1878_v26 = vshrl.u32 %v2850_v22, 16 }
  0x50   : > { %3253 = vmatpush3.bf16.msra.mxu0 %v3464_v52  ;;  %3158 = vmatprep.subr.bf16.mxu1 %v3465_v59  ;;  %v667_v49 = vshll.u32 %v615_v43, 16  ;;  %v660_v52 = vrot.slane %v658_v45, 4  ;;  %v663_v56 = vrot.slane %v661_v48, 5  ;;  %v706_v43 = vor.u32 %v705_v33, %v702_v31  ;;  %v3502_v17 = vld [vmem:[%s3612_s24 + $0x60] ss:$8 sps:$4 sm:$0xff]   ;;  %v3507_v33 = vld [vmem:[%s3987_s1 + $0x210] sm:$0xff]  }
  0x51   : > { %3254 = vmatprep.subr.bf16.mxu0 %v3466_v4  ;;  %v642_v51 = vsel %vm3683_vm2, %v637_v42, %v641_v35  ;;  %3264 = vmatprep.mubr.bf16.mxu0 %v3478_v37  ;;  %v714_v35 = vshrl.u32 %v622_v23, 16  ;;  %v3483_v37 = vld [vmem:[%s3987_s1 + $0xd0] sm:$0xff]   ;;  %v719_v45 = vrot.slane %v717_v36, 5  ;;  %v725_v48 = vrot.slane %v723_v39, 5  ;;  %v2851_v23 = vld [vmem:[%s3612_s24 + $0xc] sm:$0x1] }
  0x52   : > { %v2650_v61 = vcombine.low %v642_v51, %v656_v55  ;;  %v669_v62 = vrot.slane %v667_v49, 5  ;;  %v664_v0 = vor.u32 %v663_v56, %v660_v52  ;;  %v3484_v42 = vld [vmem:[%s3987_s1 + $0x1d0] sm:$0xff]   ;;  %v730_v49 = vrot.slane %v728_v40, 4  ;;  %v3506_v36 = vld [vmem:[%s3612_s24 + $0xc0] ss:$8 sps:$4 sm:$0xff]  }
  0x53   : > { %3159 = vmatpush3.bf16.msra.mxu1 %v3465_v59  ;;  %v3472_v59 = vld [vmem:[%s3987_s1 + $0xb0] sm:$0xff]   ;;  %v716_v44 = vrot.slane %v714_v35, 4  ;;  %v733_v50 = vrot.slane %v731_v41, 5  ;;  %v707_v51 = vrot.slane %v706_v43, 4  ;;  %v1881_v27 = vshll.u32 %v2850_v22, 16  ;;  %v3510_v43 = vld [vmem:[%s3988_s2 + $0x18] sm:$0xff]  }
  0x54   : > { %3255 = vmatpush3.bf16.msra.mxu0 %v3466_v4  ;;  %3160 = vmatprep.subr.bf16.mxu1 %v3467_v13  ;;  %v665_v2 = vrot.slane %v664_v0, 4  ;;  %v3475_v4 = vld [vmem:[%s3987_s1 + $0xb8] sm:$0xff]   ;;  %v3492_v55 = vld [vmem:[%s3612_s24 + $0x28] ss:$8 sps:$4 sm:$0xff]   ;;  %v2853_v25 = vld [vmem:[%s3612_s24 + $0x14] sm:$0x1] }
  0x55   : > { %3256 = vmatprep.subr.bf16.mxu0 %v3468_v28  ;;  %3168 = vmatprep.mubr.bf16.mxu1 %v2650_v61  ;;  %v720_v52 = vor.u32 %v719_v45, %v716_v44  ;;  %v734_v57 = vor.u32 %v733_v50, %v730_v49  ;;  %v3494_v61 = vld [vmem:[%s3612_s24 + $0x38] ss:$8 sps:$4 sm:$0xff]   ;;  %v2852_v24 = vld [vmem:[%s3612_s24 + $0x10] sm:$0xf]  ;;  %v1883_v35 = vrot.slane %v1881_v27, 5 }
  0x56   : > { %v670_v8 = vsel %vm3683_vm2, %v665_v2, %v669_v62  ;;  %v3486_v62 = vld [vmem:[%s3987_s1 + $0x1d8] sm:$0xff]   ;;  %v1895_v31 = vshll.u32 %v2852_v24, 16  ;;  %v3516_v39 = vld [vmem:[%s3612_s24 + $0x80] ss:$8 sps:$4 sm:$0xff]  }
  0x57   : > { %3161 = vmatpush3.bf16.msra.mxu1 %v3467_v13  ;;  %v2651_v13 = vcombine.low %v670_v8, %v684_v9  ;;  %v735_v0 = vrot.slane %v734_v57, 4  ;;  %v3489_v8 = vld [vmem:[%s3987_s1 + $0xe8] sm:$0xff]  }
  0x58   : > { %3257 = vmatpush3.bf16.msra.mxu0 %v3468_v28  ;;  %3162 = vmatprep.subr.bf16.mxu1 %v3469_v32  ;;  %v688_v28 = vrot.slane %v686_v19, 4  ;;  %v3490_v9 = vld [vmem:[%s3987_s1 + $0x1e8] sm:$0xff]  }
  0x59   : > { %3258 = vmatprep.subr.bf16.mxu0 %v3470_v38  ;;  %v3504_v19 = vld [vmem:[%s3988_s2 + $0x8] sm:$0xff]  }
  0x5b   : > { %3163 = vmatpush3.bf16.msra.mxu1 %v3469_v32  ;;  %v625_v32 = vld [vmem:[%s3612_s24 + $0x3c] sm:$0x1] }
  0x5c   : > { %3259 = vmatpush3.bf16.msra.mxu0 %v3470_v38  ;;  %3164 = vmatprep.subr.bf16.mxu1 %v3472_v59  ;;  %v692_v38 = vor.u32 %v691_v29, %v688_v28  ;;  %v737_v46 = vshll.u32 %v625_v32, 16  ;;  %v3508_v28 = vld [vmem:[%s3988_s2 + $0x10] sm:$0xff]   ;;  %v1887_v29 = vshll.u32 %v2851_v23, 16  ;;  %v1901_v32 = vshll.u32 %v2853_v25, 16 }
  0x5d   : > { %3260 = vmatprep.subr.bf16.mxu0 %v3473_v60  ;;  %v3518_v23 = vld [vmem:[%s3988_s2 + $0x30] sm:$0xff]  }
  0x5e   : > { %v693_v47 = vrot.slane %v692_v38, 4  ;;  %v739_v54 = vrot.slane %v737_v46, 5  ;;  %v1897_v38 = vrot.slane %v1895_v31, 5  ;;  %v1889_v41 = vrot.slane %v1887_v29, 5  ;;  %v2856_v46 = vld [vmem:[%s3612_s24 + $0x20] sm:$0xf] }
  0x5f   : > { %3165 = vmatpush3.bf16.msra.mxu1 %v3472_v59  ;;  %v712_v59 = vsel %vm3683_vm2, %v707_v51, %v711_v34  ;;  %v1880_v34 = vrot.slane %v1878_v26, 4  ;;  %v1903_v45 = vrot.slane %v1901_v32, 5  ;;  %v2858_v51 = vld [vmem:[%s3612_s24 + $0x28] sm:$0xf]  ;;  %v1923_v57 = vshll.u32 %v2856_v46, 16 }
  0x60   : > { %3261 = vmatpush3.bf16.msra.mxu0 %v3473_v60  ;;  %3166 = vmatprep.subr.bf16.mxu1 %v3475_v4  ;;  %v698_v56 = vsel %vm3683_vm2, %v693_v47, %v697_v30  ;;  %v721_v60 = vrot.slane %v720_v52, 4  ;;  %v740_v3 = vsel %vm3683_vm2, %v735_v0, %v739_v54  ;;  %v1892_v30 = vshrl.u32 %v2852_v24, 16  ;;  %v3509_v47 = vld [vmem:[%s3987_s1 + $0x218] sm:$0xff]   ;;  %v2860_v52 = vld [vmem:[%s3612_s24 + $0x30] sm:$0xf] }
  0x61   : > { %3262 = vmatprep.subr.bf16.mxu0 %v3476_v6  ;;  %v2652_v63 = vcombine.low %v698_v56, %v712_v59  ;;  %v1884_v40 = vor.u32 %v1883_v35, %v1880_v34  ;;  %v1920_v56 = vshrl.u32 %v2856_v46, 16  ;;  %v1937_v0 = vshll.u32 %v2858_v51, 16  ;;  %v3520_v34 = vld [vmem:[%s3988_s2 + $0x38] sm:$0xff]  }
  0x62   : > { %v726_v2 = vsel %vm3683_vm2, %v721_v60, %v725_v48  ;;  %v3511_v60 = vld [vmem:[%s3987_s1 + $0x220] sm:$0xff]  }
  0x63   : > { %3167 = vmatpush3.bf16.msra.mxu1 %v3475_v4  ;;  %v3497_v4 = vld [vmem:[%s3612_s24 + $0x90] ss:$8 sps:$4 sm:$0xff]   ;;  %v1885_v48 = vrot.slane %v1884_v40, 4 }
  0x64   : > { %3263 = vmatpush3.bf16.msra.mxu0 %v3476_v6  ;;  %3176 = vmatprep.subr.bf16.mxu1 %v3477_v7  ;;  %v2653_v6 = vcombine.low %v726_v2, %v740_v3  ;;  %v1951_v2 = vshll.u32 %v2860_v52, 16  ;;  %v3513_v3 = vld [vmem:[%s3987_s1 + $0x228] sm:$0xff]  }
  0x65   : > { %3272 = vmatprep.subr.bf16.mxu0 %v3479_v10  ;;  %v1890_v54 = vsel %vm3683_vm2, %v1885_v48, %v1889_v41  ;;  %v2865_v48 = vld [vmem:[%s3612_s24 + $0x44] sm:$0x1] }
  0x66   : > { %3169 = vmatmul.mubr.bf16.vlgmr.msra.gmra.mrb[0].mxu1 %v2651_v13  ;;  %v3496_v13 = vld [vmem:[%s3987_s1 + $0x1f8] sm:$0xff]  }
  0x67   : > { %3177 = vmatpush3.bf16.msra.mxu1 %v3477_v7  ;;  %3265 = vmatmul.mubr.bf16.vlgmr.msra.gmra.mrb[0].mxu0 %v3480_v11  ;;  %v3499_v7 = vld [vmem:[%s3612_s24 + $0x50] ss:$8 sps:$4 sm:$0xff]  }
  0x68   : > { %3273 = vmatpush3.bf16.msra.mxu0 %v3479_v10  ;;  %3178 = vmatprep.subr.bf16.mxu1 %v3481_v14  ;;  %v3491_v10 = vld [vmem:[%s3987_s1 + $0xf0] sm:$0xff]  }
  0x69   : > { %3274 = vmatprep.subr.bf16.mxu0 %v3482_v18  ;;  %3268 = vmatprep.mubr.bf16.mxu0 %v3492_v55  ;;  %v3493_v11 = vld [vmem:[%s3987_s1 + $0x1f0] sm:$0xff]  }
  0x6a   : > { %3172 = vmatprep.mubr.bf16.mxu1 %v2652_v63  ;;  %v1934_v63 = vshrl.u32 %v2858_v51, 16 }
  0x6b   : > { %3179 = vmatpush3.bf16.msra.mxu1 %v3481_v14  ;;  %v3498_v14 = vld [vmem:[%s3612_s24 + $0xa0] ss:$8 sps:$4 sm:$0xff]  }
  0x6c   : > { %3275 = vmatpush3.bf16.msra.mxu0 %v3482_v18  ;;  %3180 = vmatprep.subr.bf16.mxu1 %v3483_v37  ;;  %v3503_v18 = vld [vmem:[%s3987_s1 + $0x208] sm:$0xff]  }
  0x6d   : > { %3276 = vmatprep.subr.bf16.mxu0 %v3484_v42 }
  0x6e   : > { %3173 = vmatmul.mubr.bf16.gmra.mrb[4].mxu1 %v2653_v6 }
  0x6f   : > { %3181 = vmatpush3.bf16.msra.mxu1 %v3483_v37  ;;  %3269 = vmatmul.mubr.bf16.gmra.mrb[4].mxu0 %v3494_v61  ;;  %v1894_v37 = vrot.slane %v1892_v30, 4 }
  0x70   : > { %3277 = vmatpush3.bf16.msra.mxu0 %v3484_v42  ;;  %3182 = vmatprep.subr.bf16.mxu1 %v3485_v58  ;;  %v2854_v42 = vld [vmem:[%s3612_s24 + $0x18] sm:$0xf] }
  0x71   : > { %3278 = vmatprep.subr.bf16.mxu0 %v3486_v62  ;;  %3192 = vmatprep.mubr.bf16.mxu1 %v3497_v4  ;;  %v1898_v44 = vor.u32 %v1897_v38, %v1894_v37  ;;  %v1906_v50 = vshrl.u32 %v2854_v42, 16  ;;  %v1909_v55 = vshll.u32 %v2854_v42, 16  ;;  %v3514_v4 = vld [vmem:[%s3988_s2 + $0x28] sm:$0xff]  }
  0x72   : > { %3288 = vmatprep.mubr.bf16.mxu0 %v3499_v7  ;;  %v1922_v7 = vrot.slane %v1920_v56, 4 }
  0x73   : > { %3183 = vmatpush3.bf16.msra.mxu1 %v3485_v58  ;;  %v1899_v49 = vrot.slane %v1898_v44, 4  ;;  %v3512_v58 = vld [vmem:[%s3988_s2 + $0x20] sm:$0xff]   ;;  %v1911_v6 = vrot.slane %v1909_v55, 5  ;;  %v1985_v55 = vshll.u32 %v2865_v48, 16 }
  0x74   : > { %3279 = vmatpush3.bf16.msra.mxu0 %v3486_v62  ;;  %3184 = vmatprep.subr.bf16.mxu1 %v3487_v1  ;;  %v3521_v62 = vld [vmem:[%s3612_s24 + $0xd8] ss:$8 sps:$4 sm:$0xff]  }
  0x75   : > { %3280 = vmatprep.subr.bf16.mxu0 %v3488_v5  ;;  %v1904_v59 = vsel %vm3683_vm2, %v1899_v49, %v1903_v45 }
  0x76   : > { %v2882_v61 = vcombine.low %v1890_v54, %v1904_v59 }
  0x77   : > { %3185 = vmatpush3.bf16.msra.mxu1 %v3487_v1  ;;  %v1948_v1 = vshrl.u32 %v2860_v52, 16 }
  0x78   : > { %3281 = vmatpush3.bf16.msra.mxu0 %v3488_v5  ;;  %3186 = vmatprep.subr.bf16.mxu1 %v3489_v8  ;;  %v1908_v5 = vrot.slane %v1906_v50, 4 }
  0x79   : > { %3282 = vmatprep.subr.bf16.mxu0 %v3490_v9 }
  0x7b   : > { %3187 = vmatpush3.bf16.msra.mxu1 %v3489_v8  ;;  %v1925_v8 = vrot.slane %v1923_v57, 5 }
  0x7c   : > { %3283 = vmatpush3.bf16.msra.mxu0 %v3490_v9  ;;  %3188 = vmatprep.subr.bf16.mxu1 %v3491_v10  ;;  %v2855_v9 = vld [vmem:[%s3612_s24 + $0x1c] sm:$0x1] }
  0x7d   : > { %3284 = vmatprep.subr.bf16.mxu0 %v3493_v11 }
  0x7f   : > { %3189 = vmatpush3.bf16.msra.mxu1 %v3491_v10  ;;  %v2857_v10 = vld [vmem:[%s3612_s24 + $0x24] sm:$0x1] }
  0x80   : > { %3285 = vmatpush3.bf16.msra.mxu0 %v3493_v11  ;;  %3190 = vmatprep.subr.bf16.mxu1 %v3495_v12  ;;  %v2862_v11 = vld [vmem:[%s3612_s24 + $0x38] sm:$0xf]  ;;  %v1929_v22 = vshll.u32 %v2857_v10, 16 }
  0x81   : > { %3286 = vmatprep.subr.bf16.mxu0 %v3496_v13  ;;  %v1962_v24 = vshrl.u32 %v2862_v11, 16  ;;  %v1965_v25 = vshll.u32 %v2862_v11, 16 }
  0x82   : > { %v1931_v38 = vrot.slane %v1929_v22, 5 }
  0x83   : > { %3191 = vmatpush3.bf16.msra.mxu1 %v3495_v12  ;;  %v1936_v12 = vrot.slane %v1934_v63, 4  ;;  %v1964_v40 = vrot.slane %v1962_v24, 4  ;;  %v1967_v41 = vrot.slane %v1965_v25, 5  ;;  %v1987_v63 = vrot.slane %v1985_v55, 5 }
  0x84   : > { %3287 = vmatpush3.bf16.msra.mxu0 %v3496_v13  ;;  %3320 = vmatprep.subr.bf16.mxu1 %v3501_v15  ;;  %v1939_v13 = vrot.slane %v1937_v0, 5  ;;  %v3522_v0 = vld [vmem:[%s3612_s24 + $0xe8] ss:$8 sps:$4 sm:$0xff]  }
  0x85   : > { %3296 = vmatprep.subr.bf16.mxu0 %v3500_v16  ;;  %v1968_v52 = vor.u32 %v1967_v41, %v1964_v40 }
  0x86   : > { %3193 = vmatmul.mubr.bf16.vlgmr.msra.gmra.mrb[0].mxu1 %v3498_v14  ;;  %v1950_v14 = vrot.slane %v1948_v1, 4  ;;  %v1940_v29 = vor.u32 %v1939_v13, %v1936_v12  ;;  %v3523_v1 = vld [vmem:[%s3612_s24 + $0xf8] ss:$8 sps:$4 sm:$0xff]  }
  0x87   : > { %3289 = vmatmul.mubr.bf16.vlgmr.msra.gmra.mrb[0].mxu0 %v3502_v17  ;;  %3321 = vmatpush3.bf16.msra.mxu1 %v3501_v15  ;;  %v1953_v15 = vrot.slane %v1951_v2, 5  ;;  %v2859_v17 = vld [vmem:[%s3612_s24 + $0x2c] sm:$0x1] }
  0x88   : > { %3297 = vmatpush3.bf16.msra.mxu0 %v3500_v16  ;;  %3322 = vmatprep.subr.bf16.mxu1 %v3504_v19  ;;  %v2864_v16 = vld [vmem:[%s3612_s24 + $0x40] sm:$0xf]  ;;  %v1943_v30 = vshll.u32 %v2859_v17, 16  ;;  %v1941_v44 = vrot.slane %v1940_v29, 4 }
  0x89   : > { %3298 = vmatprep.subr.bf16.mxu0 %v3503_v18  ;;  %3196 = vmatprep.mubr.bf16.mxu1 %v3505_v20  ;;  %v1915_v20 = vshll.u32 %v2855_v9, 16  ;;  %v1976_v26 = vshrl.u32 %v2864_v16, 16  ;;  %v1979_v27 = vshll.u32 %v2864_v16, 16  ;;  %v1954_v31 = vor.u32 %v1953_v15, %v1950_v14 }
  0x8a   : > { %3292 = vmatprep.mubr.bf16.mxu0 %v3515_v21  ;;  %v1926_v21 = vor.u32 %v1925_v8, %v1922_v7  ;;  %v1945_v45 = vrot.slane %v1943_v30, 5 }
  0x8b   : > { %3323 = vmatpush3.bf16.msra.mxu1 %v3504_v19  ;;  %v1912_v19 = vor.u32 %v1911_v6, %v1908_v5  ;;  %v1978_v42 = vrot.slane %v1976_v26, 4  ;;  %v1955_v46 = vrot.slane %v1954_v31, 4  ;;  %v3524_v5 = vld [vmem:[%s3612_s24 + $0x108] ss:$8 sps:$4 sm:$0xff]  }
  0x8c   : > { %3299 = vmatpush3.bf16.msra.mxu0 %v3503_v18  ;;  %3324 = vmatprep.subr.bf16.mxu1 %v3508_v28  ;;  %v2861_v18 = vld [vmem:[%s3612_s24 + $0x34] sm:$0x1]  ;;  %v1927_v37 = vrot.slane %v1926_v21, 4  ;;  %v1946_v56 = vsel %vm3683_vm2, %v1941_v44, %v1945_v45 }
  0x8d   : > { %3300 = vmatprep.subr.bf16.mxu0 %v3507_v33  ;;  %v1957_v32 = vshll.u32 %v2861_v18, 16  ;;  %v1913_v35 = vrot.slane %v1912_v19, 4 }
  0x8e   : > { %3197 = vmatmul.mubr.bf16.gmra.mrb[4].mxu1 %v3506_v36  ;;  %v1917_v36 = vrot.slane %v1915_v20, 5  ;;  %v1932_v51 = vsel %vm3683_vm2, %v1927_v37, %v1931_v38 }
  0x8f   : > { %3325 = vmatpush3.bf16.msra.mxu1 %v3508_v28  ;;  %3293 = vmatmul.mubr.bf16.gmra.mrb[4].mxu0 %v3516_v39  ;;  %v3517_v28 = vld [vmem:[%s3987_s1 + $0x230] sm:$0xff]   ;;  %v2863_v39 = vld [vmem:[%s3612_s24 + $0x3c] sm:$0x1]  ;;  %s3960_s24 = scalar_lea.vmem %s3990_s4, %s2920_s15 }
  0x90   : > { %3301 = vmatpush3.bf16.msra.mxu0 %v3507_v33  ;;  %3326 = vmatprep.subr.bf16.mxu1 %v3510_v43  ;;  %v3519_v33 = vld [vmem:[%s3987_s1 + $0x238] sm:$0xff]   ;;  %v1918_v49 = vsel %vm3683_vm2, %v1913_v35, %v1917_v36  ;;  %v1971_v50 = vshll.u32 %v2863_v39, 16 }
  0x91   : > { %3302 = vmatprep.subr.bf16.mxu0 %v3509_v47  ;;  %3336 = vmatprep.mubr.bf16.mxu1 %v3521_v62 }
  0x92   : > { %3312 = vmatprep.mubr.bf16.mxu0 %v2882_v61  ;;  %v1973_v59 = vrot.slane %v1971_v50, 5  ;;  %v1969_v61 = vrot.slane %v1968_v52, 4 }
  0x93   : > { %3327 = vmatpush3.bf16.msra.mxu1 %v3510_v43  ;;  %v1981_v43 = vrot.slane %v1979_v27, 5 }
  0x94   : > { %3303 = vmatpush3.bf16.msra.mxu0 %v3509_v47  ;;  %3328 = vmatprep.subr.bf16.mxu1 %v3512_v58  ;;  %v1959_v47 = vrot.slane %v1957_v32, 5  ;;  %v1974_v2 = vsel %vm3683_vm2, %v1969_v61, %v1973_v59 }
  0x95   : > { %3304 = vmatprep.subr.bf16.mxu0 %v3511_v60  ;;  %v1982_v54 = vor.u32 %v1981_v43, %v1978_v42 }
  0x96   : > { %v1960_v57 = vsel %vm3683_vm2, %v1955_v46, %v1959_v47 }
  0x97   : > { %3329 = vmatpush3.bf16.msra.mxu1 %v3512_v58  ;;  %v2883_v58 = vcombine.low %v1918_v49, %v1932_v51  ;;  %v1983_v62 = vrot.slane %v1982_v54, 4 }
  0x98   : > { %3305 = vmatpush3.bf16.msra.mxu0 %v3511_v60  ;;  %3330 = vmatprep.subr.bf16.mxu1 %v3514_v4  ;;  %v2884_v60 = vcombine.low %v1946_v56, %v1960_v57 }
  0x99   : > { %3306 = vmatprep.subr.bf16.mxu0 %v3513_v3 }
  0x9b   : > { %3331 = vmatpush3.bf16.msra.mxu1 %v3514_v4 }
  0x9c   : > { %3307 = vmatpush3.bf16.msra.mxu0 %v3513_v3  ;;  %3332 = vmatprep.subr.bf16.mxu1 %v3518_v23  ;;  %v1988_v3 = vsel %vm3683_vm2, %v1983_v62, %v1987_v63 }
  0x9d   : > { %3308 = vmatprep.subr.bf16.mxu0 %v3517_v28  ;;  %v2885_v4 = vcombine.low %v1974_v2, %v1988_v3 }
  0x9f   : > { %3333 = vmatpush3.bf16.msra.mxu1 %v3518_v23 }
  0xa0   : > { %3309 = vmatpush3.bf16.msra.mxu0 %v3517_v28  ;;  %3334 = vmatprep.subr.bf16.mxu1 %v3520_v34 }
  0xa1   : > { %3310 = vmatprep.subr.bf16.mxu0 %v3519_v33 }
  0xa3   : > { %3335 = vmatpush3.bf16.msra.mxu1 %v3520_v34 }
  0xa4   : > { %3311 = vmatpush3.bf16.msra.mxu0 %v3519_v33 }
  0xa6   : > { %3337 = vmatmul.mubr.bf16.vlgmr.msra.gmra.mrb[8].mxu1 %v3522_v0 }
  0xa7   : > { %3313 = vmatmul.mubr.bf16.vlgmr.msra.gmra.mrb[0].mxu0 %v2883_v58  ;;  %3340 = vmatprep.mubr.bf16.mxu1 %v3523_v1 }
  0xa8   : > { %3316 = vmatprep.mubr.bf16.mxu0 %v2884_v60 }
  0xae   : > { %3341 = vmatmul.mubr.bf16.gmra.mrb[12].mxu1 %v3524_v5 }
  0xaf   : > { %3317 = vmatmul.mubr.bf16.gmra.mrb[4].mxu0 %v2885_v4 }
 0x159   : > { %v3194_v6 = vpop.f32.mrb[0].mxu1 }
 0x15a   : > { %v1027_v7 = vpop.f32.mrb[1].mxu1 }
 0x15b   : > { %v3195_v8 = vpop.f32.mrb[2].mxu1 }
 0x15c   : > { %v1030_v9 = vpop.f32.mrb[3].mxu1 }
 0x161   : > { %v3198_v10 = vpop.f32.mrb[4].mxu1 }
 0x162   : > { %v1043_v11 = vpop.f32.mrb[5].mxu1 }
 0x163   : > { %v3199_v12 = vpop.f32.mrb[6].mxu1 }
 0x164   : > { %v3954_v13 = vpop.f32.mrb[7].mxu1 }
 0x179   : > { %v3338_v14 = vpop.f32.mrb[8].mxu1 }
 0x17a   : > { %v3314_v15 = vpop.f32.mrb[0].mxu0  ;;  %v2241_v16 = vpop.f32.mrb[9].mxu1  ;;  %v2404_v30 = vmul.f32 %v3338_v14, %v3338_v14 }
 0x17b   : > { %v3344_v17 = vadd.f32 %v3314_v15, %v3194_v6  ;;  %v2104_v53 = vpop.f32.mrb[1].mxu0  ;;  %v3339_v18 = vpop.f32.mrb[10].mxu1  ;;  %v2402_v20 = vmul.f32 %v2241_v16, %v2241_v16 }
 0x17c   : > { %v3345_v19 = vadd.f32 %v2104_v53, %v1027_v7  ;;  %v3315_v21 = vpop.f32.mrb[2].mxu0  ;;  %v2966_v22 = vpack.c.bf16 %v3339_v18, %v3338_v14  ;;  %v2244_v23 = vpop.f32.mrb[11].mxu1  ;;  %v2405_v38 = vmul.f32 %v3339_v18, %v3339_v18 }
 0x17d   : > { %v3346_v24 = vadd.f32 %v3315_v21, %v3195_v8  ;;  %v2107_v25 = vpop.f32.mrb[3].mxu0  ;;  %v2961_v26 = vpack.c.bf16 %v2244_v23, %v2241_v16  ;;  %v2366_v27 = vadd.f32 %v2244_v23, %v2241_v16  ;;  %v2403_v29 = vmul.f32 %v2244_v23, %v2244_v23 }
 0x17e   : > { %2981 = vst [vmem:[%s3960_s24 + $0x8] sm:$0xff] %v2966_v22   ;;  %v3347_v28 = vadd.f32 %v2107_v25, %v1030_v9  ;;  %v2380_v31 = vmul.f32 %v3345_v19, %v3345_v19  ;;  %v2382_v41 = vmul.f32 %v3344_v17, %v3344_v17 }
 0x17f   : > { %v2946_v32 = vpack.c.bf16 %v3346_v24, %v3344_v17  ;;  %2962 = vst [vmem:[%s3960_s24] sm:$0xff] %v2961_v26   ;;  %v2367_v33 = vadd.f32 %v3338_v14, %v2366_v27  ;;  %v2410_v37 = vadd.f32 %v2403_v29, %v2402_v20  ;;  %v2383_v47 = vmul.f32 %v3346_v24, %v3346_v24 }
 0x180   : > { %v2941_v34 = vpack.c.bf16 %v3347_v28, %v3345_v19  ;;  %v2352_v35 = vadd.f32 %v3347_v28, %v3345_v19  ;;  %v2381_v36 = vmul.f32 %v3347_v28, %v3347_v28 }
 0x181   : > { %2978 = vst [vmem:[%s3965_s20 + $0x8] sm:$0xff] %v2946_v32   ;;  %v3342_v39 = vpop.f32.mrb[12].mxu1  ;;  %v2368_v40 = vadd.f32 %v3339_v18, %v2367_v33  ;;  %v2411_v44 = vadd.f32 %v2410_v37, %v2404_v30 }
 0x182   : > { %2942 = vst [vmem:[%s3965_s20] sm:$0xff] %v2941_v34   ;;  %v2353_v42 = vadd.f32 %v3344_v17, %v2352_v35  ;;  %v2388_v43 = vadd.f32 %v2381_v36, %v2380_v31  ;;  %v3318_v45 = vpop.f32.mrb[4].mxu0  ;;  %v2257_v46 = vpop.f32.mrb[13].mxu1 }
 0x183   : > { %v3348_v48 = vadd.f32 %v3318_v45, %v3198_v10  ;;  %v2120_v49 = vpop.f32.mrb[5].mxu0  ;;  %v2369_v50 = vadd.f32 %v2368_v40, %v2257_v46  ;;  %v2406_v51 = vmul.f32 %v2257_v46, %v2257_v46  ;;  %v3343_v52 = vpop.f32.mrb[14].mxu1  ;;  %v2412_v57 = vadd.f32 %v2411_v44, %v2405_v38 }
 0x184   : > { %v2389_v54 = vadd.f32 %v2388_v43, %v2382_v41  ;;  %v3349_v55 = vadd.f32 %v2120_v49, %v1043_v11  ;;  %v2354_v56 = vadd.f32 %v3346_v24, %v2353_v42  ;;  %v3319_v58 = vpop.f32.mrb[6].mxu0  ;;  %v2260_v59 = vpop.f32.mrb[15].mxu1  ;;  %v2976_v61 = vpack.c.bf16 %v3343_v52, %v3342_v39 }
 0x185   : > { %v3350_v60 = vadd.f32 %v3319_v58, %v3199_v12  ;;  %v2123_v62 = vpop.f32.mrb[7].mxu0  ;;  %v2413_v2 = vadd.f32 %v2412_v57, %v2406_v51  ;;  %v2971_v5 = vpack.c.bf16 %v2260_v59, %v2257_v46  ;;  %v2370_v7 = vadd.f32 %v2369_v50, %v2260_v59 }
 0x186   : > { %v2355_v63 = vadd.f32 %v3349_v55, %v2354_v56  ;;  %v2384_v0 = vmul.f32 %v3349_v55, %v3349_v55  ;;  %v2390_v1 = vadd.f32 %v2389_v54, %v2383_v47  ;;  %2983 = vst [vmem:[%s3960_s24 + $0x18] sm:$0xff] %v2976_v61   ;;  %v3351_v4 = vadd.f32 %v2123_v62, %v3954_v13 }
 0x187   : > { %v2956_v3 = vpack.c.bf16 %v3350_v60, %v3348_v48  ;;  %v2407_v8 = vmul.f32 %v2260_v59, %v2260_v59  ;;  %2982 = vst [vmem:[%s3960_s24 + $0x10] sm:$0xff] %v2971_v5   ;;  %v2408_v12 = vmul.f32 %v3342_v39, %v3342_v39  ;;  %v2371_v14 = vadd.f32 %v3342_v39, %v2370_v7 }
 0x188   : > { %v2391_v6 = vadd.f32 %v2390_v1, %v2384_v0  ;;  %v2951_v9 = vpack.c.bf16 %v3351_v4, %v3349_v55  ;;  %v2356_v10 = vadd.f32 %v3351_v4, %v2355_v63  ;;  %v2385_v11 = vmul.f32 %v3351_v4, %v3351_v4 }
 0x189   : > { %2980 = vst [vmem:[%s3965_s20 + $0x18] sm:$0xff] %v2956_v3   ;;  %v2414_v15 = vadd.f32 %v2413_v2, %v2407_v8  ;;  %v2386_v16 = vmul.f32 %v3348_v48, %v3348_v48  ;;  %v2409_v18 = vmul.f32 %v3343_v52, %v3343_v52  ;;  %v2372_v19 = vadd.f32 %v3343_v52, %v2371_v14 }
 0x18a   : > { %2979 = vst [vmem:[%s3965_s20 + $0x10] sm:$0xff] %v2951_v9   ;;  %v2357_v17 = vadd.f32 %v3348_v48, %v2356_v10  ;;  %v2392_v53 = vadd.f32 %v2391_v6, %v2385_v11  ;;  %v2387_v13 = vmul.f32 %v3350_v60, %v3350_v60 }
 0x18b   : > { %v2415_v20 = vadd.f32 %v2414_v15, %v2408_v12  ;;  %v2373_v23 = vrot.slane %v2372_v19, 4 }
 0x18c   : > { %v2358_v21 = vadd.f32 %v3350_v60, %v2357_v17  ;;  %v2393_v22 = vadd.f32 %v2392_v53, %v2386_v16 }
 0x18d   : > { %v2416_v24 = vadd.f32 %v2415_v20, %v2409_v18  ;;  %v2374_v27 = vadd.f32 %v2373_v23, %v2372_v19 }
 0x18e   : > { %v2359_v25 = vrot.slane %v2358_v21, 4  ;;  %v2394_v26 = vadd.f32 %v2393_v22, %v2387_v13 }
 0x18f   : > { %v2417_v28 = vrot.slane %v2416_v24, 4  ;;  %v2375_v31 = vrot.slane %v2374_v27, 2 }
 0x190   : > { %v2360_v29 = vadd.f32 %v2359_v25, %v2358_v21  ;;  %v2395_v30 = vrot.slane %v2394_v26, 4 }
 0x191   : > { %v2418_v32 = vadd.f32 %v2417_v28, %v2416_v24  ;;  %v2376_v35 = vadd.f32 %v2375_v31, %v2374_v27 }
 0x192   : > { %v2361_v33 = vrot.slane %v2360_v29, 2  ;;  %v2396_v34 = vadd.f32 %v2395_v30, %v2394_v26 }
 0x193   : > { %v2419_v36 = vrot.slane %v2418_v32, 2  ;;  %v2377_v39 = vrot.slane %v2376_v35, 1 }
 0x194   : > { %v2362_v37 = vadd.f32 %v2361_v33, %v2360_v29  ;;  %v2397_v38 = vrot.slane %v2396_v34, 2 }
 0x195   : > { %v2420_v40 = vadd.f32 %v2419_v36, %v2418_v32  ;;  %v2378_v43 = vadd.f32 %v2377_v39, %v2376_v35 }
 0x196   : > { %v2363_v41 = vrot.slane %v2362_v37, 1  ;;  %v2398_v42 = vadd.f32 %v2397_v38, %v2396_v34 }
 0x197   : > { %v2421_v44 = vrot.slane %v2420_v40, 1  ;;  %2379 = vst [vmem:[%s280_s27 + $0x1] sm:$0x1] %v2378_v43 }
 0x198   : > { %v2364_v45 = vadd.f32 %v2363_v41, %v2362_v37  ;;  %v2399_v46 = vrot.slane %v2398_v42, 1 }
 0x199   : > { %v2422_v47 = vadd.f32 %v2421_v44, %v2420_v40 }
 0x19a   : > { %v2400_v48 = vadd.f32 %v2399_v46, %v2398_v42  ;;  %2365 = vst [vmem:[%s280_s27] sm:$0x1] %v2364_v45 }
 0x19b   : > { %2423 = vst [vmem:[%s284_s22 + $0x1] sm:$0x1] %v2422_v47 }
 0x19c   : > { %2401 = vst [vmem:[%s284_s22] sm:$0x1] %v2400_v48 }
 0x19d PF: > { %s17_s21 = sadd.s32 1, %s3531_s21  }
 0x19e   : > { %p14_p4 = scmp.ge.s32.totalorder %s17_s21, 4  }
 0x1a0   :  { %16 = sbr.rel (!%p14_p4) target bundleno = 1 (0x1), region = 111 }

</bundles_post_ra>
